<compile_context>
chip_gen: v7x
topology: tpu7x:2x2x1
jax: 0.10.0
libtpu: 0.0.40
codegen_flags: <defaults>
</compile_context>

<pallas_src>
import functools

import jax
import jax.numpy as jnp
from jax import lax
from jax.experimental import pallas as pl
from jax.experimental.pallas import tpu as pltpu


def _round_up(x, m):
    return ((x + m - 1) // m) * m


def _segmatch_kernel(x_ref, wih_ref, whh_ref, brzn_ref, bhn_ref,
                     wproj_ref, bproj_ref, out_ref, h_ref, gi_ref,
                     *, t_total, tc, bt, hp, unroll):
    """One (batch block, time chunk) grid step of the GRU + projection + L2 norm.

    x_ref    : (1, Tc*Bt, E)   embedded chunk (time-major inside the batch block)
    wih_ref  : (E, 3*Hp)       fused, lane-padded input->hidden weights [r|z|n]
    whh_ref  : (Hp, 3*Hp)      fused, lane-padded hidden->hidden weights [r|z|n]
    brzn_ref : (1, 3*Hp)       [b_ir+b_hr | b_iz+b_hz | b_in] (lane-padded)
    bhn_ref  : (1, Hp)         b_hn (applied inside r * (...))
    wproj_ref: (Hp, P)         ProjBeg weight (transposed; zero rows beyond H)
    bproj_ref: (1, P)          ProjBeg bias
    out_ref  : (1, Bt, P)      L2-normalized projection (written on last chunk)
    h_ref    : (Bt, Hp)        VMEM scratch carrying the hidden state over chunks
    gi_ref   : (Tc*Bt, 3*Hp)   VMEM scratch holding the hoisted input projections
    """
    t_blk = pl.program_id(1)

    @pl.when(t_blk == 0)
    def _init():
        h_ref[...] = jnp.zeros_like(h_ref)

    # Hoisted input->hidden projection: one wide MXU pass (N = 3*Hp) per chunk.
    # Stored to VMEM so the recurrence reloads (Bt, 3*Hp) slices per step instead
    # of keeping the whole gi block resident in vregs.
    x = x_ref[0]                                                   # (Tc*Bt, E)
    gi_ref[...] = (jnp.dot(x, wih_ref[...], preferred_element_type=jnp.float32)
                   + brzn_ref[...])

    whh = whh_ref[...]                                             # (Hp, 3*Hp)
    cdt = whh.dtype                                                # matmul operand dtype
    b_hn = jnp.broadcast_to(bhn_ref[...], (bt, hp))                # hoisted once
    chunk_base = t_blk * tc
    partial_last = (t_total % tc) != 0                             # Python constant

    def step(t, h):
        lo = pl.multiple_of(t * bt, bt)
        gi = gi_ref[pl.ds(lo, bt), :]                              # (Bt, 3*Hp)
        # ONE fused hidden->hidden matmul per step (r|z|n lane-concatenated).
        gh = jnp.dot(h.astype(cdt), whh, preferred_element_type=jnp.float32)
        # One EUP sigmoid over the contiguous r|z lanes, then lane-aligned split.
        rz = jax.nn.sigmoid(gi[:, :2 * hp] + gh[:, :2 * hp])
        r = rz[:, :hp]
        z = rz[:, hp:]
        n = jnp.tanh(gi[:, 2 * hp:] + r * (gh[:, 2 * hp:] + b_hn))
        h_new = (1.0 - z) * n + z * h
        if partial_last:
            # Mask the zero-padded time steps of the partial last chunk.
            h_new = jnp.where(chunk_base + t < t_total, h_new, h)
        return h_new

    h_ref[...] = lax.fori_loop(0, tc, step, h_ref[...], unroll=unroll)

    @pl.when(t_blk == pl.num_programs(1) - 1)
    def _finish():
        proj = jnp.dot(h_ref[...], wproj_ref[...],
                       preferred_element_type=jnp.float32) + bproj_ref[...]
        # F.normalize(p=2, dim=1): x / max(||x||, 1e-12) == x * rsqrt(max(||x||^2, 1e-24))
        sumsq = jnp.sum(proj * proj, axis=1, keepdims=True)
        out_ref[0] = proj * lax.rsqrt(jnp.maximum(sumsq, 1e-24))   # EUP, not divide


def prepare_kernel_params(params, compute_dtype=jnp.bfloat16):
    """PyTorch-layout GRU/Linear params -> fused, lane-padded kernel layout."""
    H = params["b_hh"].shape[0] // 3
    E = params["w_ih"].shape[1]
    P = params["w_proj"].shape[0]
    Hp = _round_up(max(H, 128), 128)          # pad each gate to a 128-lane boundary

    w_ih = params["w_ih"].reshape(3, H, E)    # PyTorch gate order [r|z|n]
    w_hh = params["w_hh"].reshape(3, H, H)
    b_ih = params["b_ih"].reshape(3, H)
    b_hh = params["b_hh"].reshape(3, H)

    wih_f = jnp.zeros((E, 3 * Hp), jnp.float32)
    whh_f = jnp.zeros((Hp, 3 * Hp), jnp.float32)
    brzn = jnp.zeros((1, 3 * Hp), jnp.float32)
    for g in range(3):
        wih_f = wih_f.at[:, g * Hp:g * Hp + H].set(w_ih[g].T)
        whh_f = whh_f.at[:H, g * Hp:g * Hp + H].set(w_hh[g].T)
    brzn = brzn.at[0, 0:H].set(b_ih[0] + b_hh[0])            # r (hidden bias folded)
    brzn = brzn.at[0, Hp:Hp + H].set(b_ih[1] + b_hh[1])      # z (hidden bias folded)
    brzn = brzn.at[0, 2 * Hp:2 * Hp + H].set(b_ih[2])        # n: input bias only
    bhn = jnp.zeros((1, Hp), jnp.float32).at[0, :H].set(b_hh[2])

    wproj_f = jnp.zeros((Hp, P), jnp.float32).at[:H, :].set(params["w_proj"].T)
    bproj = params["b_proj"].reshape(1, P)

    # Recurrence matmul operands go to compute_dtype (bf16 by default); biases,
    # final projection and all elementwise math stay in f32.
    return (wih_f.astype(compute_dtype), whh_f.astype(compute_dtype),
            brzn, bhn, wproj_f, bproj, Hp, E, P)


def _pick_batch_tile(batch):
    """Large tile to amortize the serial recurrence; keep >=2 batch blocks when
    the batch allows it (v7x has 2 TensorCores and only the 'parallel' axis can
    split across them); cap at 256 to bound the VMEM working set."""
    b8 = _round_up(batch, 8)
    if b8 <= 8:
        return 8
    return max(8, min(256, _round_up((b8 + 1) // 2, 8)))


def segmatch_forward(tokens, params, *, max_time_chunk=64, batch_tile=None,
                     compute_dtype=jnp.bfloat16, unroll=8):
    """tokens: (B, T) int32 token ids. Returns (B, size_target) float32."""
    (wih_f, whh_f, brzn, bhn, wproj_f, bproj, Hp, E, P) = prepare_kernel_params(
        params, compute_dtype)

    B, T = tokens.shape
    Bt = batch_tile if batch_tile is not None else _pick_batch_tile(B)
    B_pad = _round_up(B, Bt)
    n_b = B_pad // Bt
    Tc = min(max_time_chunk, T)
    n_t = -(-T // Tc)
    T_pad = n_t * Tc

    # Embedding gather = plain-JAX glue; pad batch (to the tile) and time (to a
    # multiple of the chunk; padded steps are masked inside the kernel).
    emb = params["embedding"][tokens].astype(jnp.float32)          # (B, T, E)
    emb = jnp.pad(emb, ((0, B_pad - B), (0, T_pad - T), (0, 0)))
    # time-major within each batch block: row index = t*Bt + b
    x = emb.reshape(n_b, Bt, T_pad, E).transpose(0, 2, 1, 3).reshape(n_b, T_pad * Bt, E)
    x = x.astype(compute_dtype)
    # TODO(synk): E=32 keeps the x stream lane-sparse (32/128 lanes); if the real
    #             model uses emb >= 128 this is moot, otherwise pack 4 steps/row.

    kernel = functools.partial(_segmatch_kernel, t_total=T, tc=Tc, bt=Bt, hp=Hp,
                               unroll=max(1, min(unroll, Tc)))

    out = pl.pallas_call(
        kernel,
        out_shape=jax.ShapeDtypeStruct((n_b, Bt, P), jnp.float32),
        grid_spec=pltpu.PrefetchScalarGridSpec(
            num_scalar_prefetch=0,
            grid=(n_b, n_t),
            in_specs=[
                pl.BlockSpec((1, Tc * Bt, E), lambda b, t: (b, t, 0)),
                pl.BlockSpec((E, 3 * Hp), lambda b, t: (0, 0)),
                pl.BlockSpec((Hp, 3 * Hp), lambda b, t: (0, 0)),
                pl.BlockSpec((1, 3 * Hp), lambda b, t: (0, 0)),
                pl.BlockSpec((1, Hp), lambda b, t: (0, 0)),
                pl.BlockSpec((Hp, P), lambda b, t: (0, 0)),
                pl.BlockSpec((1, P), lambda b, t: (0, 0)),
            ],
            out_specs=pl.BlockSpec((1, Bt, P), lambda b, t: (b, 0, 0)),
            scratch_shapes=[
                pltpu.VMEM((Bt, Hp), jnp.float32),            # carried hidden state
                pltpu.VMEM((Tc * Bt, 3 * Hp), jnp.float32),   # hoisted gate inputs
            ],
        ),
        compiler_params=pltpu.CompilerParams(
            dimension_semantics=("parallel", "arbitrary"),
            # Worst case (Bt=256, Tc=64): ~25 MiB gi scratch + ~8 MiB double-buffered
            # bf16 x block (E lane-padded) + small weights -> under 48 MiB, safe on
            # v7x's 64 MiB physical VMEM with headroom left on v5e/v6e.
            vmem_limit_bytes=48 << 20,
        ),
    )(x, wih_f, whh_f, brzn, bhn, wproj_f, bproj)

    return out.reshape(B_pad, P)[:B]


def segmatch_reference(tokens, params):
    """Pure-JAX reference of the PyTorch forward (for correctness checking)."""
    emb = params["embedding"][tokens].astype(jnp.float32)          # (B, T, E)
    H = params["b_hh"].shape[0] // 3
    hp = lax.Precision.HIGHEST
    w_ih, w_hh = params["w_ih"], params["w_hh"]
    b_ih, b_hh = params["b_ih"], params["b_hh"]

    def cell(h, x_t):
        gi = jnp.dot(x_t, w_ih.T, precision=hp) + b_ih
        gh = jnp.dot(h, w_hh.T, precision=hp) + b_hh
        i_r, i_z, i_n = gi[:, :H], gi[:, H:2 * H], gi[:, 2 * H:]
        h_r, h_z, h_n = gh[:, :H], gh[:, H:2 * H], gh[:, 2 * H:]
        r = jax.nn.sigmoid(i_r + h_r)
        z = jax.nn.sigmoid(i_z + h_z)
        n = jnp.tanh(i_n + r * h_n)
        return (1.0 - z) * n + z * h, None

    h0 = jnp.zeros((emb.shape[0], H), jnp.float32)
    h_last, _ = lax.scan(cell, h0, jnp.transpose(emb, (1, 0, 2)))
    proj = jnp.dot(h_last, params["w_proj"].T, precision=hp) + params["b_proj"]
    norm = jnp.maximum(jnp.linalg.norm(proj, axis=1, keepdims=True), 1e-12)
    return proj / norm


def init_params(key, vocab=16, emb=32, hidden=32, size_target=32):
    ks = jax.random.split(key, 7)
    s = 0.1
    return {
        "embedding": s * jax.random.normal(ks[0], (vocab, emb), jnp.float32),
        # PyTorch GRU layout: weight_ih (3H, E), weight_hh (3H, H), gate order [r|z|n]
        "w_ih": s * jax.random.normal(ks[1], (3 * hidden, emb), jnp.float32),
        "w_hh": s * jax.random.normal(ks[2], (3 * hidden, hidden), jnp.float32),
        "b_ih": s * jax.random.normal(ks[3], (3 * hidden,), jnp.float32),
        "b_hh": s * jax.random.normal(ks[4], (3 * hidden,), jnp.float32),
        # ProjBeg: Linear(hidden -> size_target), PyTorch layout (out, in)
        "w_proj": s * jax.random.normal(ks[5], (size_target, hidden), jnp.float32),
        "b_proj": s * jax.random.normal(ks[6], (size_target,), jnp.float32),
    }


if __name__ == "__main__":
    key = jax.random.PRNGKey(0)
    kp, kt = jax.random.split(key)

    B, T, VOCAB, EMB, HID, PROJ = 2, 8, 16, 32, 32, 32
    params = init_params(kp, vocab=VOCAB, emb=EMB, hidden=HID, size_target=PROJ)
    tokens = jax.random.randint(kt, (B, T), 0, VOCAB, dtype=jnp.int32)

    ref = jax.block_until_ready(segmatch_reference(tokens, params))

    # 1) f32 matmul operands: strict check vs the pure-JAX reference.
    out_f32 = jax.block_until_ready(
        segmatch_forward(tokens, params, compute_dtype=jnp.float32))
    assert out_f32.shape == (B, PROJ) and out_f32.dtype == jnp.float32
    assert float(jnp.max(jnp.abs(out_f32 - ref))) < 2e-3

    # 2) f32 operands with a partial last time chunk (T=8, Tc=5) to exercise the
    #    masked-tail path that replaces the old Tc=1 degeneracy.
    out_part = jax.block_until_ready(
        segmatch_forward(tokens, params, compute_dtype=jnp.float32, max_time_chunk=5))
    assert float(jnp.max(jnp.abs(out_part - ref))) < 2e-3

    # 3) default perf config: bf16 matmul operands (looser tolerance accounts for
    #    bf16 quantization of x and the weights; state/elementwise math is f32).
    out_bf16 = jax.block_until_ready(segmatch_forward(tokens, params))
    assert out_bf16.shape == (B, PROJ) and out_bf16.dtype == jnp.float32
    norms = jnp.linalg.norm(out_bf16, axis=1)
    assert bool(jnp.all(jnp.abs(norms - 1.0) < 1e-3))
    assert float(jnp.max(jnp.abs(out_bf16 - ref))) < 2e-2

    print("KERNEL_OK")
</pallas_src>

<mosaic_0001>
module attributes {stable_mosaic.version = 11 : i64} {
  func.func @_segmatch_kernel(%arg0: i32, %arg1: i32, %arg2: memref<1x64x32xf32, #tpu.memory_space<vmem>>, %arg3: memref<32x384xf32, #tpu.memory_space<vmem>>, %arg4: memref<128x384xf32, #tpu.memory_space<vmem>>, %arg5: memref<1x384xf32, #tpu.memory_space<vmem>>, %arg6: memref<1x128xf32, #tpu.memory_space<vmem>>, %arg7: memref<128x32xf32, #tpu.memory_space<vmem>>, %arg8: memref<1x32xf32, #tpu.memory_space<vmem>>, %arg9: memref<1x8x32xf32, #tpu.memory_space<vmem>>, %arg10: memref<8x128xf32, #tpu.memory_space<vmem>>, %arg11: memref<64x384xf32, #tpu.memory_space<vmem>>) attributes {dimension_semantics = [#tpu.dimension_semantics<parallel>, #tpu.dimension_semantics<arbitrary>], iteration_bounds = array<i64: 1, 1>, scalar_prefetch = 0 : i64, scratch_operands = 2 : i64, tpu.core_type = #tpu.core_type<tc>, window_params = [{transform_indices = @transform_0, window_bounds = array<i64: 1, 64, 32>}, {pipeline_mode = #tpu.pipeline_mode<synchronous>, transform_indices = @transform_1, window_bounds = array<i64: 32, 384>}, {pipeline_mode = #tpu.pipeline_mode<synchronous>, transform_indices = @transform_2, window_bounds = array<i64: 128, 384>}, {pipeline_mode = #tpu.pipeline_mode<synchronous>, transform_indices = @transform_3, window_bounds = array<i64: 1, 384>}, {pipeline_mode = #tpu.pipeline_mode<synchronous>, transform_indices = @transform_4, window_bounds = array<i64: 1, 128>}, {pipeline_mode = #tpu.pipeline_mode<synchronous>, transform_indices = @transform_5, window_bounds = array<i64: 128, 32>}, {pipeline_mode = #tpu.pipeline_mode<synchronous>, transform_indices = @transform_6, window_bounds = array<i64: 1, 32>}, {transform_indices = @transform_7, window_bounds = array<i64: 1, 8, 32>}]} {
    %c0_i32 = arith.constant 0 : i32
    %0 = arith.cmpi eq, %arg1, %c0_i32 : i32
    %1 = arith.extui %0 : i1 to i32
    %c0_i32_0 = arith.constant 0 : i32
    %2 = arith.cmpi ne, %1, %c0_i32_0 : i32
    scf.if %2 {
      %cst_60 = arith.constant 0.000000e+00 : f32
      %228 = vector.broadcast %cst_60 : f32 to vector<8x128xf32>
      %c0_61 = arith.constant 0 : index
      %c0_62 = arith.constant 0 : index
      %229 = vector.load %arg10[%c0_61, %c0_62] : memref<8x128xf32, #tpu.memory_space<vmem>>, vector<8x128xf32>
      tpu.vector_store %arg10[%c0_61, %c0_62], %228 {strides = array<i32>} : memref<8x128xf32, #tpu.memory_space<vmem>>, vector<8x128xf32>,
    } else {
    }
    %c0 = arith.constant 0 : index
    %c0_1 = arith.constant 0 : index
    %c0_2 = arith.constant 0 : index
    %3 = vector.load %arg2[%c0, %c0_1, %c0_2] : memref<1x64x32xf32, #tpu.memory_space<vmem>>, vector<1x64x32xf32>
    %4 = vector.shape_cast %3 : vector<1x64x32xf32> to vector<64x32xf32>
    %c0_3 = arith.constant 0 : index
    %c0_4 = arith.constant 0 : index
    %5 = vector.load %arg3[%c0_3, %c0_4] : memref<32x384xf32, #tpu.memory_space<vmem>>, vector<32x384xf32>
    %cst = arith.constant dense<0.000000e+00> : vector<64x384xf32>
    %6 = tpu.matmul %4, %5, %cst {dimension_numbers = #tpu.dot_dimension_numbers<[1], [0], [0], [1], [0, 0, 1, 1], [], []>} : vector<64x32xf32>, vector<32x384xf32>, vector<64x384xf32> -> vector<64x384xf32>
    %c0_5 = arith.constant 0 : index
    %c0_6 = arith.constant 0 : index
    %7 = vector.load %arg5[%c0_5, %c0_6] : memref<1x384xf32, #tpu.memory_space<vmem>>, vector<1x384xf32>
    %8 = vector.broadcast %7 : vector<1x384xf32> to vector<64x384xf32>
    %9 = arith.addf %6, %8 : vector<64x384xf32>
    %c0_7 = arith.constant 0 : index
    %c0_8 = arith.constant 0 : index
    %10 = vector.load %arg11[%c0_7, %c0_8] : memref<64x384xf32, #tpu.memory_space<vmem>>, vector<64x384xf32>
    tpu.vector_store %arg11[%c0_7, %c0_8], %9 {strides = array<i32>} : memref<64x384xf32, #tpu.memory_space<vmem>>, vector<64x384xf32>,
    %c0_9 = arith.constant 0 : index
    %c0_10 = arith.constant 0 : index
    %11 = vector.load %arg4[%c0_9, %c0_10] : memref<128x384xf32, #tpu.memory_space<vmem>>, vector<128x384xf32>
    %c0_11 = arith.constant 0 : index
    %c0_12 = arith.constant 0 : index
    %12 = vector.load %arg6[%c0_11, %c0_12] : memref<1x128xf32, #tpu.memory_space<vmem>>, vector<1x128xf32>
    %13 = vector.shape_cast %12 : vector<1x128xf32> to vector<1x128xf32>
    %14 = vector.broadcast %13 : vector<1x128xf32> to vector<8x128xf32>
    %c0_13 = arith.constant 0 : index
    %c0_14 = arith.constant 0 : index
    %15 = vector.load %arg10[%c0_13, %c0_14] : memref<8x128xf32, #tpu.memory_space<vmem>>, vector<8x128xf32>
    %c0_i32_15 = arith.constant 0 : i32
    %c8_i32 = arith.constant 8 : i32
    %16 = arith.muli %c0_i32_15, %c8_i32 : i32
    %17 = tpu.assume_multiple %16, 8 : i32
    %18 = arith.index_cast %17 : i32 to index
    %c0_16 = arith.constant 0 : index
    %19 = vector.load %arg11[%18, %c0_16] : memref<64x384xf32, #tpu.memory_space<vmem>>, vector<8x384xf32>
    %cst_17 = arith.constant dense<0.000000e+00> : vector<8x384xf32>
    %20 = tpu.matmul %15, %11, %cst_17 {dimension_numbers = #tpu.dot_dimension_numbers<[1], [0], [0], [1], [0, 0, 1, 1], [], []>} : vector<8x128xf32>, vector<128x384xf32>, vector<8x384xf32> -> vector<8x384xf32>
    %21 = vector.extract_strided_slice %19 {offsets = [0, 0], sizes = [8, 256], strides = [1, 1]} : vector<8x384xf32> to vector<8x256xf32>
    %22 = vector.extract_strided_slice %20 {offsets = [0, 0], sizes = [8, 256], strides = [1, 1]} : vector<8x384xf32> to vector<8x256xf32>
    %23 = arith.addf %21, %22 : vector<8x256xf32>
    %24 = arith.negf %23 : vector<8x256xf32>
    %25 = math.exp %24 : vector<8x256xf32>
    %cst_18 = arith.constant 1.000000e+00 : f32
    %26 = vector.broadcast %cst_18 : f32 to vector<8x256xf32>
    %27 = arith.addf %26, %25 : vector<8x256xf32>
    %28 = arith.divf %26, %27 : vector<8x256xf32>
    %29 = vector.extract_strided_slice %28 {offsets = [0, 0], sizes = [8, 128], strides = [1, 1]} : vector<8x256xf32> to vector<8x128xf32>
    %30 = vector.extract_strided_slice %28 {offsets = [0, 128], sizes = [8, 128], strides = [1, 1]} : vector<8x256xf32> to vector<8x128xf32>
    %31 = vector.extract_strided_slice %19 {offsets = [0, 256], sizes = [8, 128], strides = [1, 1]} : vector<8x384xf32> to vector<8x128xf32>
    %32 = vector.extract_strided_slice %20 {offsets = [0, 256], sizes = [8, 128], strides = [1, 1]} : vector<8x384xf32> to vector<8x128xf32>
    %33 = arith.addf %32, %14 : vector<8x128xf32>
    %34 = arith.mulf %29, %33 : vector<8x128xf32>
    %35 = arith.addf %31, %34 : vector<8x128xf32>
    %36 = math.tanh %35 : vector<8x128xf32>
    %cst_19 = arith.constant 1.000000e+00 : f32
    %37 = vector.broadcast %cst_19 : f32 to vector<8x128xf32>
    %38 = arith.subf %37, %30 : vector<8x128xf32>
    %39 = arith.mulf %38, %36 : vector<8x128xf32>
    %40 = arith.mulf %30, %15 : vector<8x128xf32>
    %41 = arith.addf %39, %40 : vector<8x128xf32>
    %c1_i32 = arith.constant 1 : i32
    %c8_i32_20 = arith.constant 8 : i32
    %42 = arith.muli %c1_i32, %c8_i32_20 : i32
    %43 = tpu.assume_multiple %42, 8 : i32
    %44 = arith.index_cast %43 : i32 to index
    %c0_21 = arith.constant 0 : index
    %45 = vector.load %arg11[%44, %c0_21] : memref<64x384xf32, #tpu.memory_space<vmem>>, vector<8x384xf32>
    %cst_22 = arith.constant dense<0.000000e+00> : vector<8x384xf32>
    %46 = tpu.matmul %41, %11, %cst_22 {dimension_numbers = #tpu.dot_dimension_numbers<[1], [0], [0], [1], [0, 0, 1, 1], [], []>} : vector<8x128xf32>, vector<128x384xf32>, vector<8x384xf32> -> vector<8x384xf32>
    %47 = vector.extract_strided_slice %45 {offsets = [0, 0], sizes = [8, 256], strides = [1, 1]} : vector<8x384xf32> to vector<8x256xf32>
    %48 = vector.extract_strided_slice %46 {offsets = [0, 0], sizes = [8, 256], strides = [1, 1]} : vector<8x384xf32> to vector<8x256xf32>
    %49 = arith.addf %47, %48 : vector<8x256xf32>
    %50 = arith.negf %49 : vector<8x256xf32>
    %51 = math.exp %50 : vector<8x256xf32>
    %cst_23 = arith.constant 1.000000e+00 : f32
    %52 = vector.broadcast %cst_23 : f32 to vector<8x256xf32>
    %53 = arith.addf %52, %51 : vector<8x256xf32>
    %54 = arith.divf %52, %53 : vector<8x256xf32>
    %55 = vector.extract_strided_slice %54 {offsets = [0, 0], sizes = [8, 128], strides = [1, 1]} : vector<8x256xf32> to vector<8x128xf32>
    %56 = vector.extract_strided_slice %54 {offsets = [0, 128], sizes = [8, 128], strides = [1, 1]} : vector<8x256xf32> to vector<8x128xf32>
    %57 = vector.extract_strided_slice %45 {offsets = [0, 256], sizes = [8, 128], strides = [1, 1]} : vector<8x384xf32> to vector<8x128xf32>
    %58 = vector.extract_strided_slice %46 {offsets = [0, 256], sizes = [8, 128], strides = [1, 1]} : vector<8x384xf32> to vector<8x128xf32>
    %59 = arith.addf %58, %14 : vector<8x128xf32>
    %60 = arith.mulf %55, %59 : vector<8x128xf32>
    %61 = arith.addf %57, %60 : vector<8x128xf32>
    %62 = math.tanh %61 : vector<8x128xf32>
    %cst_24 = arith.constant 1.000000e+00 : f32
    %63 = vector.broadcast %cst_24 : f32 to vector<8x128xf32>
    %64 = arith.subf %63, %56 : vector<8x128xf32>
    %65 = arith.mulf %64, %62 : vector<8x128xf32>
    %66 = arith.mulf %56, %41 : vector<8x128xf32>
    %67 = arith.addf %65, %66 : vector<8x128xf32>
    %c2_i32 = arith.constant 2 : i32
    %c8_i32_25 = arith.constant 8 : i32
    %68 = arith.muli %c2_i32, %c8_i32_25 : i32
    %69 = tpu.assume_multiple %68, 8 : i32
    %70 = arith.index_cast %69 : i32 to index
    %c0_26 = arith.constant 0 : index
    %71 = vector.load %arg11[%70, %c0_26] : memref<64x384xf32, #tpu.memory_space<vmem>>, vector<8x384xf32>
    %cst_27 = arith.constant dense<0.000000e+00> : vector<8x384xf32>
    %72 = tpu.matmul %67, %11, %cst_27 {dimension_numbers = #tpu.dot_dimension_numbers<[1], [0], [0], [1], [0, 0, 1, 1], [], []>} : vector<8x128xf32>, vector<128x384xf32>, vector<8x384xf32> -> vector<8x384xf32>
    %73 = vector.extract_strided_slice %71 {offsets = [0, 0], sizes = [8, 256], strides = [1, 1]} : vector<8x384xf32> to vector<8x256xf32>
    %74 = vector.extract_strided_slice %72 {offsets = [0, 0], sizes = [8, 256], strides = [1, 1]} : vector<8x384xf32> to vector<8x256xf32>
    %75 = arith.addf %73, %74 : vector<8x256xf32>
    %76 = arith.negf %75 : vector<8x256xf32>
    %77 = math.exp %76 : vector<8x256xf32>
    %cst_28 = arith.constant 1.000000e+00 : f32
    %78 = vector.broadcast %cst_28 : f32 to vector<8x256xf32>
    %79 = arith.addf %78, %77 : vector<8x256xf32>
    %80 = arith.divf %78, %79 : vector<8x256xf32>
    %81 = vector.extract_strided_slice %80 {offsets = [0, 0], sizes = [8, 128], strides = [1, 1]} : vector<8x256xf32> to vector<8x128xf32>
    %82 = vector.extract_strided_slice %80 {offsets = [0, 128], sizes = [8, 128], strides = [1, 1]} : vector<8x256xf32> to vector<8x128xf32>
    %83 = vector.extract_strided_slice %71 {offsets = [0, 256], sizes = [8, 128], strides = [1, 1]} : vector<8x384xf32> to vector<8x128xf32>
    %84 = vector.extract_strided_slice %72 {offsets = [0, 256], sizes = [8, 128], strides = [1, 1]} : vector<8x384xf32> to vector<8x128xf32>
    %85 = arith.addf %84, %14 : vector<8x128xf32>
    %86 = arith.mulf %81, %85 : vector<8x128xf32>
    %87 = arith.addf %83, %86 : vector<8x128xf32>
    %88 = math.tanh %87 : vector<8x128xf32>
    %cst_29 = arith.constant 1.000000e+00 : f32
    %89 = vector.broadcast %cst_29 : f32 to vector<8x128xf32>
    %90 = arith.subf %89, %82 : vector<8x128xf32>
    %91 = arith.mulf %90, %88 : vector<8x128xf32>
    %92 = arith.mulf %82, %67 : vector<8x128xf32>
    %93 = arith.addf %91, %92 : vector<8x128xf32>
    %c3_i32 = arith.constant 3 : i32
    %c8_i32_30 = arith.constant 8 : i32
    %94 = arith.muli %c3_i32, %c8_i32_30 : i32
    %95 = tpu.assume_multiple %94, 8 : i32
    %96 = arith.index_cast %95 : i32 to index
    %c0_31 = arith.constant 0 : index
    %97 = vector.load %arg11[%96, %c0_31] : memref<64x384xf32, #tpu.memory_space<vmem>>, vector<8x384xf32>
    %cst_32 = arith.constant dense<0.000000e+00> : vector<8x384xf32>
    %98 = tpu.matmul %93, %11, %cst_32 {dimension_numbers = #tpu.dot_dimension_numbers<[1], [0], [0], [1], [0, 0, 1, 1], [], []>} : vector<8x128xf32>, vector<128x384xf32>, vector<8x384xf32> -> vector<8x384xf32>
    %99 = vector.extract_strided_slice %97 {offsets = [0, 0], sizes = [8, 256], strides = [1, 1]} : vector<8x384xf32> to vector<8x256xf32>
    %100 = vector.extract_strided_slice %98 {offsets = [0, 0], sizes = [8, 256], strides = [1, 1]} : vector<8x384xf32> to vector<8x256xf32>
    %101 = arith.addf %99, %100 : vector<8x256xf32>
    %102 = arith.negf %101 : vector<8x256xf32>
    %103 = math.exp %102 : vector<8x256xf32>
    %cst_33 = arith.constant 1.000000e+00 : f32
    %104 = vector.broadcast %cst_33 : f32 to vector<8x256xf32>
    %105 = arith.addf %104, %103 : vector<8x256xf32>
    %106 = arith.divf %104, %105 : vector<8x256xf32>
    %107 = vector.extract_strided_slice %106 {offsets = [0, 0], sizes = [8, 128], strides = [1, 1]} : vector<8x256xf32> to vector<8x128xf32>
    %108 = vector.extract_strided_slice %106 {offsets = [0, 128], sizes = [8, 128], strides = [1, 1]} : vector<8x256xf32> to vector<8x128xf32>
    %109 = vector.extract_strided_slice %97 {offsets = [0, 256], sizes = [8, 128], strides = [1, 1]} : vector<8x384xf32> to vector<8x128xf32>
    %110 = vector.extract_strided_slice %98 {offsets = [0, 256], sizes = [8, 128], strides = [1, 1]} : vector<8x384xf32> to vector<8x128xf32>
    %111 = arith.addf %110, %14 : vector<8x128xf32>
    %112 = arith.mulf %107, %111 : vector<8x128xf32>
    %113 = arith.addf %109, %112 : vector<8x128xf32>
    %114 = math.tanh %113 : vector<8x128xf32>
    %cst_34 = arith.constant 1.000000e+00 : f32
    %115 = vector.broadcast %cst_34 : f32 to vector<8x128xf32>
    %116 = arith.subf %115, %108 : vector<8x128xf32>
    %117 = arith.mulf %116, %114 : vector<8x128xf32>
    %118 = arith.mulf %108, %93 : vector<8x128xf32>
    %119 = arith.addf %117, %118 : vector<8x128xf32>
    %c4_i32 = arith.constant 4 : i32
    %c8_i32_35 = arith.constant 8 : i32
    %120 = arith.muli %c4_i32, %c8_i32_35 : i32
    %121 = tpu.assume_multiple %120, 8 : i32
    %122 = arith.index_cast %121 : i32 to index
    %c0_36 = arith.constant 0 : index
    %123 = vector.load %arg11[%122, %c0_36] : memref<64x384xf32, #tpu.memory_space<vmem>>, vector<8x384xf32>
    %cst_37 = arith.constant dense<0.000000e+00> : vector<8x384xf32>
    %124 = tpu.matmul %119, %11, %cst_37 {dimension_numbers = #tpu.dot_dimension_numbers<[1], [0], [0], [1], [0, 0, 1, 1], [], []>} : vector<8x128xf32>, vector<128x384xf32>, vector<8x384xf32> -> vector<8x384xf32>
    %125 = vector.extract_strided_slice %123 {offsets = [0, 0], sizes = [8, 256], strides = [1, 1]} : vector<8x384xf32> to vector<8x256xf32>
    %126 = vector.extract_strided_slice %124 {offsets = [0, 0], sizes = [8, 256], strides = [1, 1]} : vector<8x384xf32> to vector<8x256xf32>
    %127 = arith.addf %125, %126 : vector<8x256xf32>
    %128 = arith.negf %127 : vector<8x256xf32>
    %129 = math.exp %128 : vector<8x256xf32>
    %cst_38 = arith.constant 1.000000e+00 : f32
    %130 = vector.broadcast %cst_38 : f32 to vector<8x256xf32>
    %131 = arith.addf %130, %129 : vector<8x256xf32>
    %132 = arith.divf %130, %131 : vector<8x256xf32>
    %133 = vector.extract_strided_slice %132 {offsets = [0, 0], sizes = [8, 128], strides = [1, 1]} : vector<8x256xf32> to vector<8x128xf32>
    %134 = vector.extract_strided_slice %132 {offsets = [0, 128], sizes = [8, 128], strides = [1, 1]} : vector<8x256xf32> to vector<8x128xf32>
    %135 = vector.extract_strided_slice %123 {offsets = [0, 256], sizes = [8, 128], strides = [1, 1]} : vector<8x384xf32> to vector<8x128xf32>
    %136 = vector.extract_strided_slice %124 {offsets = [0, 256], sizes = [8, 128], strides = [1, 1]} : vector<8x384xf32> to vector<8x128xf32>
    %137 = arith.addf %136, %14 : vector<8x128xf32>
    %138 = arith.mulf %133, %137 : vector<8x128xf32>
    %139 = arith.addf %135, %138 : vector<8x128xf32>
    %140 = math.tanh %139 : vector<8x128xf32>
    %cst_39 = arith.constant 1.000000e+00 : f32
    %141 = vector.broadcast %cst_39 : f32 to vector<8x128xf32>
    %142 = arith.subf %141, %134 : vector<8x128xf32>
    %143 = arith.mulf %142, %140 : vector<8x128xf32>
    %144 = arith.mulf %134, %119 : vector<8x128xf32>
    %145 = arith.addf %143, %144 : vector<8x128xf32>
    %c5_i32 = arith.constant 5 : i32
    %c8_i32_40 = arith.constant 8 : i32
    %146 = arith.muli %c5_i32, %c8_i32_40 : i32
    %147 = tpu.assume_multiple %146, 8 : i32
    %148 = arith.index_cast %147 : i32 to index
    %c0_41 = arith.constant 0 : index
    %149 = vector.load %arg11[%148, %c0_41] : memref<64x384xf32, #tpu.memory_space<vmem>>, vector<8x384xf32>
    %cst_42 = arith.constant dense<0.000000e+00> : vector<8x384xf32>
    %150 = tpu.matmul %145, %11, %cst_42 {dimension_numbers = #tpu.dot_dimension_numbers<[1], [0], [0], [1], [0, 0, 1, 1], [], []>} : vector<8x128xf32>, vector<128x384xf32>, vector<8x384xf32> -> vector<8x384xf32>
    %151 = vector.extract_strided_slice %149 {offsets = [0, 0], sizes = [8, 256], strides = [1, 1]} : vector<8x384xf32> to vector<8x256xf32>
    %152 = vector.extract_strided_slice %150 {offsets = [0, 0], sizes = [8, 256], strides = [1, 1]} : vector<8x384xf32> to vector<8x256xf32>
    %153 = arith.addf %151, %152 : vector<8x256xf32>
    %154 = arith.negf %153 : vector<8x256xf32>
    %155 = math.exp %154 : vector<8x256xf32>
    %cst_43 = arith.constant 1.000000e+00 : f32
    %156 = vector.broadcast %cst_43 : f32 to vector<8x256xf32>
    %157 = arith.addf %156, %155 : vector<8x256xf32>
    %158 = arith.divf %156, %157 : vector<8x256xf32>
    %159 = vector.extract_strided_slice %158 {offsets = [0, 0], sizes = [8, 128], strides = [1, 1]} : vector<8x256xf32> to vector<8x128xf32>
    %160 = vector.extract_strided_slice %158 {offsets = [0, 128], sizes = [8, 128], strides = [1, 1]} : vector<8x256xf32> to vector<8x128xf32>
    %161 = vector.extract_strided_slice %149 {offsets = [0, 256], sizes = [8, 128], strides = [1, 1]} : vector<8x384xf32> to vector<8x128xf32>
    %162 = vector.extract_strided_slice %150 {offsets = [0, 256], sizes = [8, 128], strides = [1, 1]} : vector<8x384xf32> to vector<8x128xf32>
    %163 = arith.addf %162, %14 : vector<8x128xf32>
    %164 = arith.mulf %159, %163 : vector<8x128xf32>
    %165 = arith.addf %161, %164 : vector<8x128xf32>
    %166 = math.tanh %165 : vector<8x128xf32>
    %cst_44 = arith.constant 1.000000e+00 : f32
    %167 = vector.broadcast %cst_44 : f32 to vector<8x128xf32>
    %168 = arith.subf %167, %160 : vector<8x128xf32>
    %169 = arith.mulf %168, %166 : vector<8x128xf32>
    %170 = arith.mulf %160, %145 : vector<8x128xf32>
    %171 = arith.addf %169, %170 : vector<8x128xf32>
    %c6_i32 = arith.constant 6 : i32
    %c8_i32_45 = arith.constant 8 : i32
    %172 = arith.muli %c6_i32, %c8_i32_45 : i32
    %173 = tpu.assume_multiple %172, 8 : i32
    %174 = arith.index_cast %173 : i32 to index
    %c0_46 = arith.constant 0 : index
    %175 = vector.load %arg11[%174, %c0_46] : memref<64x384xf32, #tpu.memory_space<vmem>>, vector<8x384xf32>
    %cst_47 = arith.constant dense<0.000000e+00> : vector<8x384xf32>
    %176 = tpu.matmul %171, %11, %cst_47 {dimension_numbers = #tpu.dot_dimension_numbers<[1], [0], [0], [1], [0, 0, 1, 1], [], []>} : vector<8x128xf32>, vector<128x384xf32>, vector<8x384xf32> -> vector<8x384xf32>
    %177 = vector.extract_strided_slice %175 {offsets = [0, 0], sizes = [8, 256], strides = [1, 1]} : vector<8x384xf32> to vector<8x256xf32>
    %178 = vector.extract_strided_slice %176 {offsets = [0, 0], sizes = [8, 256], strides = [1, 1]} : vector<8x384xf32> to vector<8x256xf32>
    %179 = arith.addf %177, %178 : vector<8x256xf32>
    %180 = arith.negf %179 : vector<8x256xf32>
    %181 = math.exp %180 : vector<8x256xf32>
    %cst_48 = arith.constant 1.000000e+00 : f32
    %182 = vector.broadcast %cst_48 : f32 to vector<8x256xf32>
    %183 = arith.addf %182, %181 : vector<8x256xf32>
    %184 = arith.divf %182, %183 : vector<8x256xf32>
    %185 = vector.extract_strided_slice %184 {offsets = [0, 0], sizes = [8, 128], strides = [1, 1]} : vector<8x256xf32> to vector<8x128xf32>
    %186 = vector.extract_strided_slice %184 {offsets = [0, 128], sizes = [8, 128], strides = [1, 1]} : vector<8x256xf32> to vector<8x128xf32>
    %187 = vector.extract_strided_slice %175 {offsets = [0, 256], sizes = [8, 128], strides = [1, 1]} : vector<8x384xf32> to vector<8x128xf32>
    %188 = vector.extract_strided_slice %176 {offsets = [0, 256], sizes = [8, 128], strides = [1, 1]} : vector<8x384xf32> to vector<8x128xf32>
    %189 = arith.addf %188, %14 : vector<8x128xf32>
    %190 = arith.mulf %185, %189 : vector<8x128xf32>
    %191 = arith.addf %187, %190 : vector<8x128xf32>
    %192 = math.tanh %191 : vector<8x128xf32>
    %cst_49 = arith.constant 1.000000e+00 : f32
    %193 = vector.broadcast %cst_49 : f32 to vector<8x128xf32>
    %194 = arith.subf %193, %186 : vector<8x128xf32>
    %195 = arith.mulf %194, %192 : vector<8x128xf32>
    %196 = arith.mulf %186, %171 : vector<8x128xf32>
    %197 = arith.addf %195, %196 : vector<8x128xf32>
    %c7_i32 = arith.constant 7 : i32
    %c8_i32_50 = arith.constant 8 : i32
    %198 = arith.muli %c7_i32, %c8_i32_50 : i32
    %199 = tpu.assume_multiple %198, 8 : i32
    %200 = arith.index_cast %199 : i32 to index
    %c0_51 = arith.constant 0 : index
    %201 = vector.load %arg11[%200, %c0_51] : memref<64x384xf32, #tpu.memory_space<vmem>>, vector<8x384xf32>
    %cst_52 = arith.constant dense<0.000000e+00> : vector<8x384xf32>
    %202 = tpu.matmul %197, %11, %cst_52 {dimension_numbers = #tpu.dot_dimension_numbers<[1], [0], [0], [1], [0, 0, 1, 1], [], []>} : vector<8x128xf32>, vector<128x384xf32>, vector<8x384xf32> -> vector<8x384xf32>
    %203 = vector.extract_strided_slice %201 {offsets = [0, 0], sizes = [8, 256], strides = [1, 1]} : vector<8x384xf32> to vector<8x256xf32>
    %204 = vector.extract_strided_slice %202 {offsets = [0, 0], sizes = [8, 256], strides = [1, 1]} : vector<8x384xf32> to vector<8x256xf32>
    %205 = arith.addf %203, %204 : vector<8x256xf32>
    %206 = arith.negf %205 : vector<8x256xf32>
    %207 = math.exp %206 : vector<8x256xf32>
    %cst_53 = arith.constant 1.000000e+00 : f32
    %208 = vector.broadcast %cst_53 : f32 to vector<8x256xf32>
    %209 = arith.addf %208, %207 : vector<8x256xf32>
    %210 = arith.divf %208, %209 : vector<8x256xf32>
    %211 = vector.extract_strided_slice %210 {offsets = [0, 0], sizes = [8, 128], strides = [1, 1]} : vector<8x256xf32> to vector<8x128xf32>
    %212 = vector.extract_strided_slice %210 {offsets = [0, 128], sizes = [8, 128], strides = [1, 1]} : vector<8x256xf32> to vector<8x128xf32>
    %213 = vector.extract_strided_slice %201 {offsets = [0, 256], sizes = [8, 128], strides = [1, 1]} : vector<8x384xf32> to vector<8x128xf32>
    %214 = vector.extract_strided_slice %202 {offsets = [0, 256], sizes = [8, 128], strides = [1, 1]} : vector<8x384xf32> to vector<8x128xf32>
    %215 = arith.addf %214, %14 : vector<8x128xf32>
    %216 = arith.mulf %211, %215 : vector<8x128xf32>
    %217 = arith.addf %213, %216 : vector<8x128xf32>
    %218 = math.tanh %217 : vector<8x128xf32>
    %cst_54 = arith.constant 1.000000e+00 : f32
    %219 = vector.broadcast %cst_54 : f32 to vector<8x128xf32>
    %220 = arith.subf %219, %212 : vector<8x128xf32>
    %221 = arith.mulf %220, %218 : vector<8x128xf32>
    %222 = arith.mulf %212, %197 : vector<8x128xf32>
    %223 = arith.addf %221, %222 : vector<8x128xf32>
    %c8_i32_55 = arith.constant 8 : i32
    %c0_56 = arith.constant 0 : index
    %c0_57 = arith.constant 0 : index
    %224 = vector.load %arg10[%c0_56, %c0_57] : memref<8x128xf32, #tpu.memory_space<vmem>>, vector<8x128xf32>
    tpu.vector_store %arg10[%c0_56, %c0_57], %223 {strides = array<i32>} : memref<8x128xf32, #tpu.memory_space<vmem>>, vector<8x128xf32>,
    %c0_i32_58 = arith.constant 0 : i32
    %225 = arith.cmpi eq, %arg1, %c0_i32_58 : i32
    %226 = arith.extui %225 : i1 to i32
    %c0_i32_59 = arith.constant 0 : i32
    %227 = arith.cmpi ne, %226, %c0_i32_59 : i32
    scf.if %227 {
      %c0_60 = arith.constant 0 : index
      %c0_61 = arith.constant 0 : index
      %228 = vector.load %arg10[%c0_60, %c0_61] : memref<8x128xf32, #tpu.memory_space<vmem>>, vector<8x128xf32>
      %c0_62 = arith.constant 0 : index
      %c0_63 = arith.constant 0 : index
      %229 = vector.load %arg7[%c0_62, %c0_63] : memref<128x32xf32, #tpu.memory_space<vmem>>, vector<128x32xf32>
      %cst_64 = arith.constant dense<0.000000e+00> : vector<8x32xf32>
      %230 = tpu.matmul %228, %229, %cst_64 {dimension_numbers = #tpu.dot_dimension_numbers<[1], [0], [0], [1], [0, 0, 1, 1], [], []>} : vector<8x128xf32>, vector<128x32xf32>, vector<8x32xf32> -> vector<8x32xf32>
      %c0_65 = arith.constant 0 : index
      %c0_66 = arith.constant 0 : index
      %231 = vector.load %arg8[%c0_65, %c0_66] : memref<1x32xf32, #tpu.memory_space<vmem>>, vector<1x32xf32>
      %232 = vector.broadcast %231 : vector<1x32xf32> to vector<8x32xf32>
      %233 = arith.addf %230, %232 : vector<8x32xf32>
      %234 = arith.mulf %233, %233 : vector<8x32xf32>
      %cst_67 = arith.constant dense<0.000000e+00> : vector<8xf32>
      %235 = vector.multi_reduction <add>, %234, %cst_67 [1] : vector<8x32xf32> to vector<8xf32>
      %236 = vector.shape_cast %235 : vector<8xf32> to vector<8x1xf32>
      %cst_68 = arith.constant 1.000000e-24 : f32
      %237 = vector.broadcast %cst_68 : f32 to vector<8x1xf32>
      %238 = arith.maximumf %236, %237 : vector<8x1xf32>
      %239 = math.rsqrt %238 : vector<8x1xf32>
      %240 = vector.broadcast %239 : vector<8x1xf32> to vector<8x32xf32>
      %241 = arith.mulf %233, %240 : vector<8x32xf32>
      %c0_69 = arith.constant 0 : index
      %c0_70 = arith.constant 0 : index
      %c0_71 = arith.constant 0 : index
      %242 = vector.load %arg9[%c0_69, %c0_70, %c0_71] : memref<1x8x32xf32, #tpu.memory_space<vmem>>, vector<1x8x32xf32>
      %243 = vector.shape_cast %242 : vector<1x8x32xf32> to vector<8x32xf32>
      %244 = vector.shape_cast %241 : vector<8x32xf32> to vector<1x8x32xf32>
      tpu.vector_store %arg9[%c0_69, %c0_70, %c0_71], %244 {strides = array<i32>} : memref<1x8x32xf32, #tpu.memory_space<vmem>>, vector<1x8x32xf32>,
    } else {
    }
    return
  }
  func.func @transform_0(%arg0: i32, %arg1: i32) -> (i32, i32, i32) {
    %c0_i32 = arith.constant 0 : i32
    %c0_i32_0 = arith.constant 0 : i32
    return %arg0, %arg1, %c0_i32 : i32, i32, i32
  }
  func.func @transform_1(%arg0: i32, %arg1: i32) -> (i32, i32) {
    %c0_i32 = arith.constant 0 : i32
    %c0_i32_0 = arith.constant 0 : i32
    %c0_i32_1 = arith.constant 0 : i32
    return %c0_i32, %c0_i32_0 : i32, i32
  }
  func.func @transform_2(%arg0: i32, %arg1: i32) -> (i32, i32) {
    %c0_i32 = arith.constant 0 : i32
    %c0_i32_0 = arith.constant 0 : i32
    %c0_i32_1 = arith.constant 0 : i32
    return %c0_i32, %c0_i32_0 : i32, i32
  }
  func.func @transform_3(%arg0: i32, %arg1: i32) -> (i32, i32) {
    %c0_i32 = arith.constant 0 : i32
    %c0_i32_0 = arith.constant 0 : i32
    %c0_i32_1 = arith.constant 0 : i32
    return %c0_i32, %c0_i32_0 : i32, i32
  }
  func.func @transform_4(%arg0: i32, %arg1: i32) -> (i32, i32) {
    %c0_i32 = arith.constant 0 : i32
    %c0_i32_0 = arith.constant 0 : i32
    %c0_i32_1 = arith.constant 0 : i32
    return %c0_i32, %c0_i32_0 : i32, i32
  }
  func.func @transform_5(%arg0: i32, %arg1: i32) -> (i32, i32) {
    %c0_i32 = arith.constant 0 : i32
    %c0_i32_0 = arith.constant 0 : i32
    %c0_i32_1 = arith.constant 0 : i32
    return %c0_i32, %c0_i32_0 : i32, i32
  }
  func.func @transform_6(%arg0: i32, %arg1: i32) -> (i32, i32) {
    %c0_i32 = arith.constant 0 : i32
    %c0_i32_0 = arith.constant 0 : i32
    %c0_i32_1 = arith.constant 0 : i32
    return %c0_i32, %c0_i32_0 : i32, i32
  }
  func.func @transform_7(%arg0: i32, %arg1: i32) -> (i32, i32, i32) {
    %c0_i32 = arith.constant 0 : i32
    %c0_i32_0 = arith.constant 0 : i32
    %c0_i32_1 = arith.constant 0 : i32
    return %arg0, %c0_i32, %c0_i32_0 : i32, i32, i32
  }
}

</mosaic_0001>

<bundles_post_ra>
// kernel: tpu_custom_call.1
= control target key start
LH: loop header
LB: loop body
LE: loop exit
PB: predicated region body
PF: predicated region fallthrough
CT: control target
= control target key end

     0   :  { %12 = vsyncpa [#allocation5], 0  ;;  %s3687_s0 = inlined_call_operand.vmem [shape: f32[1,64,32], index: 0, kind: input, shape index: {}]   ;;  %s3688_s1 = inlined_call_operand.vmem [shape: f32[32,384], index: 1, kind: input, shape index: {}]   ;;  %s3689_s2 = inlined_call_operand.hbm [shape: f32[128,384], index: 2, kind: input, shape index: {}]   ;;  %s3690_s3 = inlined_call_operand.vmem [shape: f32[1,384], index: 3, kind: input, shape index: {}]   ;;  %s3691_s4 = inlined_call_operand.vmem [shape: f32[1,128], index: 4, kind: input, shape index: {}]   ;;  %s3692_s5 = inlined_call_operand.vmem [shape: f32[128,32], index: 5, kind: input, shape index: {}]   ;;  %s3693_s6 = inlined_call_operand.vmem [shape: f32[1,32], index: 6, kind: input, shape index: {}]   ;;  %s3694_s7 = inlined_call_operand.hbm [shape: f32[1,8,32], index: 7, kind: output, shape index: {}]  }
   0x1   :  { %13 = vsyncpa [#allocation6], 0  ;;  %s3077_s24 = smov [#allocation4]   ;;  %s3029_s28 = scalar_lea.hbm %s3689_s2, 6144 }
   0x2   :  { %s23_s25 = sshll.u32 %s3077_s24, 4  ;;  %p3030_p0 = scmp.ne.s32.totalorder %s3689_s2, %s3029_s28  ;;  %s24_s25 = int_to_ptr.vmem [resolvable:$true] %s23_s25 }
   0x3   :  { %p3033_p1 = scmp.lt.u32.totalorder %s3029_s28, %s3689_s2 }
   0x5   :  { %p3035_p2 = pnand %p3033_p1, %p3030_p0 }
   0x7   :  { %3038 = shalt.err (!%p3035_p2)
}
   0x8   :  { %s3039_s10 = scalar_lea.vmem %s24_s25, 6144  ;;  %p3044_p4 = scmp.lt.s32.totalorder %s24_s25, %s24_s25 }
   0x9   :  { %p3040_p3 = scmp.ne.s32.totalorder %s24_s25, %s3039_s10  ;;  %p3045_p5 = scmp.lt.s32.totalorder %s3039_s10, %s3039_s10 }
   0xb   :  { %p3046_p6 = por %p3045_p5, %p3044_p4 }
   0xd   :  { %p3047_p7 = pnand %p3046_p6, %p3040_p3 }
   0xf   :  { %3050 = shalt.err (!%p3047_p7)
}
  0x10   :  { %s3078_s11 = smov 384   ;;  %s3079_s12 = smov 24  }
  0x11   :  { %29 = dma.hbm_to_vmem [thread:$0]  %s3689_s2, 6144, %s24_s25, [#allocation5], %s3078_s11, %s3078_s11, %s3079_s12  }
  0x12   :  { %3073 = dma.done.wait [#allocation5], 6144  }
  0x13   :  { %3074 = vsyncadd [#allocation5], 4294961152  ;;  %v3080_v0 = vmov 0.0   ;;  %v55_v1 = vld [vmem:[%s3688_s1 + $0x8] sm:$0xff]  ;;  %v58_v2 = vld [vmem:[%s3688_s1 + $0x20] sm:$0xff]  ;;  %vm83_vm0 = vcmask 261120  }
  0x14   :  { %172 = vmatprep.mubr.f32.mxu0 %v3080_v0  ;;  %v54_v3 = vld [vmem:[%s3688_s1] sm:$0xff]  ;;  %v2420_v4 = vpack.c.bf16 %v58_v2, %v55_v1  ;;  %v57_v5 = vld [vmem:[%s3688_s1 + $0x18] sm:$0xff]  ;;  %v64_v7 = vld [vmem:[%s3688_s1 + $0x50] sm:$0xff]  ;;  %v3081_v57 = vmov 0.0|0.0   ;;  %vm3082_vm1 = vmmov 0   ;;  %s3083_s12 = smov [#allocation7]  }
  0x15   :  { %v61_v6 = vld [vmem:[%s3688_s1 + $0x38] sm:$0xff]  ;;  %v2422_v8 = vpack.c.bf16 %v57_v5, %v54_v3  ;;  %v60_v10 = vld [vmem:[%s3688_s1 + $0x30] sm:$0xff]  ;;  %v63_v11 = vld [vmem:[%s3688_s1 + $0x48] sm:$0xff]  ;;  %s1870_s13 = sshll.u32 %s3083_s12, 4  ;;  %s1871_s13 = int_to_ptr.vmem [resolvable:$true] %s1870_s13 }
  0x16   :  { %v2424_v9 = vpack.c.bf16 %v64_v7, %v61_v6  ;;  %v46_v12 = vld [vmem:[%s3687_s0] sm:$0xff]  ;;  %2421 = vmatprep.subr.bf16.mxu0 %v2420_v4  ;;  %v351_v13 = vld [vmem:[#allocation4 + $0x8] sm:$0xff]  ;;  %v2426_v15 = vpack.c.bf16 %v63_v11, %v60_v10  ;;  %v353_v18 = vld [vmem:[#allocation4 + $0x18] sm:$0xff]  ;;  %s3051_s14 = scalar_lea.vmem %s1871_s13, 128  ;;  %p3056_p9 = scmp.lt.s32.totalorder %s1871_s13, %s1871_s13 }
  0x17   :  { %v354_v14 = vld [vmem:[#allocation4 + $0x20] sm:$0xff]  ;;  %2093 = vmatprep.mubr.msk.f32.mxu1 %vm83_vm0, %v46_v12  ;;  %2423 = vmatpush1.bf16.msra.mxu0 %v2422_v8  ;;  %v357_v19 = vld [vmem:[#allocation4 + $0x38] sm:$0xff]  ;;  %v360_v20 = vld [vmem:[#allocation4 + $0x50] sm:$0xff]  ;;  %p3052_p8 = scmp.ne.s32.totalorder %s1871_s13, %s3051_s14  ;;  %p3057_p10 = scmp.lt.s32.totalorder %s3051_s14, %s3051_s14 }
  0x18   :  { %2425 = vmatprep.subr.bf16.mxu0 %v2424_v9  ;;  %v3165_v16 = vpack.c.bf16 %v354_v14, %v351_v13  ;;  %v350_v17 = vld [vmem:[#allocation4] sm:$0xff]  ;;  %v3170_v22 = vpack.c.bf16 %v360_v20, %v357_v19  ;;  %v356_v23 = vld [vmem:[#allocation4 + $0x30] sm:$0xff]  ;;  %v359_v24 = vld [vmem:[#allocation4 + $0x48] sm:$0xff] }
  0x19   :  { %v3167_v21 = vpack.c.bf16 %v353_v18, %v350_v17  ;;  %v363_v25 = vld [vmem:[#allocation4 + $0x68] sm:$0xff]  ;;  %v366_v26 = vld [vmem:[#allocation4 + $0x80] sm:$0xff]  ;;  %v56_v27 = vld [vmem:[%s3688_s1 + $0x10] sm:$0xff]  ;;  %v3184_v30 = vpack.c.bf16 %v359_v24, %v356_v23  ;;  %p3058_p11 = por %p3057_p10, %p3056_p9 }
  0x1a   :  { %v59_v28 = vld [vmem:[%s3688_s1 + $0x28] sm:$0xff]  ;;  %v362_v31 = vld [vmem:[#allocation4 + $0x60] sm:$0xff]  ;;  %v3187_v33 = vpack.c.bf16 %v366_v26, %v363_v25  ;;  %v365_v34 = vld [vmem:[#allocation4 + $0x78] sm:$0xff] }
  0x1b   :  { %2427 = vmatpush1.bf16.msra.mxu0 %v2426_v15  ;;  %v47_v29 = vld [vmem:[%s3687_s0 + $0x8] sm:$0xff]  ;;  %v2428_v32 = vpack.c.bf16 %v59_v28, %v56_v27  ;;  %v62_v35 = vld [vmem:[%s3688_s1 + $0x40] sm:$0xff]  ;;  %v65_v36 = vld [vmem:[%s3688_s1 + $0x58] sm:$0xff]  ;;  %v3201_v41 = vpack.c.bf16 %v365_v34, %v362_v31  ;;  %p3059_p12 = pnand %p3058_p11, %p3052_p8 }
  0x1c   :  { %2437 = vmatprep.subr.bf16.mxu0 %v3165_v16  ;;  %v369_v37 = vld [vmem:[#allocation4 + $0x98] sm:$0xff]  ;;  %v372_v38 = vld [vmem:[#allocation4 + $0xb0] sm:$0xff]  ;;  %v2432_v39 = vpack.c.bf16 %v65_v36, %v62_v35  ;;  %v355_v43 = vld [vmem:[#allocation4 + $0x28] sm:$0xff] }
  0x1d   :  { %2429 = vmatprep.subr.bf16.mxu1 %v2428_v32  ;;  %v48_v40 = vld [vmem:[%s3687_s0 + $0x10] sm:$0xff]  ;;  %v3204_v44 = vpack.c.bf16 %v372_v38, %v369_v37  ;;  %v371_v46 = vld [vmem:[#allocation4 + $0xa8] sm:$0xff]  ;;  %v378_v48 = vld [vmem:[#allocation4 + $0xe0] sm:$0xff] }
  0x1e   :  { %1886 = vmatmul.mubr.msk.f32.vlgmr.msra.gmra.mrb[0].mxu0 %vm83_vm0, %v46_v12  ;;  %2431 = vmatpush3.bf16.msra.mxu1 %v2428_v32  ;;  %v352_v42 = vld [vmem:[#allocation4 + $0x10] sm:$0xff]  ;;  %v375_v47 = vld [vmem:[#allocation4 + $0xc8] sm:$0xff]  ;;  %v49_v50 = vld [vmem:[%s3687_s0 + $0x18] sm:$0xff] }
  0x1f   :  { %2439 = vmatpush1.bf16.msra.mxu0 %v3167_v21  ;;  %178 = vmatprep.mubr.f32.mxu0 %v3080_v0  ;;  %v368_v45 = vld [vmem:[#allocation4 + $0x90] sm:$0xff]  ;;  %v3207_v49 = vpack.c.bf16 %v355_v43, %v352_v42  ;;  %v358_v52 = vld [vmem:[#allocation4 + $0x40] sm:$0xff]  ;;  %v361_v53 = vld [vmem:[#allocation4 + $0x58] sm:$0xff]  ;;  %v3217_v54 = vpack.c.bf16 %v378_v48, %v375_v47  ;;  %v68_v43 = vlaneseq }
  0x20   :  { %2441 = vmatprep.subr.bf16.mxu0 %v3170_v22  ;;  %2433 = vmatprep.subr.bf16.mxu1 %v2432_v39  ;;  %v3214_v51 = vpack.c.bf16 %v371_v46, %v368_v45  ;;  %v374_v55 = vld [vmem:[#allocation4 + $0xc0] sm:$0xff]  ;;  %v377_v56 = vld [vmem:[#allocation4 + $0xd8] sm:$0xff]  ;;  %v384_v59 = vld [vmem:[#allocation4 + $0x110] sm:$0xff]  ;;  %v3223_v60 = vpack.c.bf16 %v361_v53, %v358_v52 }
  0x21   :  { %v381_v58 = vld [vmem:[#allocation4 + $0xf8] sm:$0xff]  ;;  %v50_v61 = vld [vmem:[%s3687_s0 + $0x20] sm:$0xff]  ;;  %v3230_v62 = vpack.c.bf16 %v377_v56, %v374_v55  ;;  %v364_v63 = vld [vmem:[#allocation4 + $0x70] sm:$0xff]  ;;  %v69_v45 = vshrl.u32 %v68_v43, 7 }
  0x22   :  { %1887 = vmatmul.mubr.msk.f32.gmra.mrb[2].mxu0 %vm83_vm0, %v47_v29  ;;  %2435 = vmatpush3.bf16.msra.mxu1 %v2432_v39  ;;  %v367_v1 = vld [vmem:[#allocation4 + $0x88] sm:$0xff]  ;;  %v3233_v2 = vpack.c.bf16 %v384_v59, %v381_v58  ;;  %v380_v3 = vld [vmem:[#allocation4 + $0xf0] sm:$0xff]  ;;  %v390_v6 = vld [vmem:[#allocation4 + $0x140] sm:$0xff] }
  0x23   :  { %2443 = vmatpush1.bf16.msra.mxu0 %v3184_v30  ;;  %184 = vmatprep.mubr.f32.mxu0 %v3080_v0  ;;  %v383_v4 = vld [vmem:[#allocation4 + $0x108] sm:$0xff]  ;;  %v3239_v7 = vpack.c.bf16 %v367_v1, %v364_v63  ;;  %v370_v10 = vld [vmem:[#allocation4 + $0xa0] sm:$0xff]  ;;  %v373_v11 = vld [vmem:[#allocation4 + $0xb8] sm:$0xff]  ;;  %v78_v46 = vsub.s32 2, %v69_v45  ;;  %v74_v1 = vsub.s32 1, %v69_v45 }
  0x24   :  { %2445 = vmatprep.subr.bf16.mxu0 %v3187_v33  ;;  %2468 = vmatprep.subr.bf16.mxu1 %v3081_v57  ;;  %v387_v5 = vld [vmem:[#allocation4 + $0x128] sm:$0xff]  ;;  %v3246_v9 = vpack.c.bf16 %v383_v4, %v380_v3  ;;  %v386_v13 = vld [vmem:[#allocation4 + $0x120] sm:$0xff]  ;;  %v389_v14 = vld [vmem:[#allocation4 + $0x138] sm:$0xff]  ;;  %v3255_v18 = vpack.c.bf16 %v373_v11, %v370_v10 }
  0x25   :  { %2094 = vmatmul.mubr.msk.f32.vlgmr.msra.gmra.mrb[0].mxu1 %vm83_vm0, %v47_v29  ;;  %v51_v8 = vld [vmem:[%s3687_s0 + $0x28] sm:$0xff]  ;;  %v3249_v12 = vpack.c.bf16 %v390_v6, %v387_v5  ;;  %v393_v15 = vld [vmem:[#allocation4 + $0x158] sm:$0xff]  ;;  %v396_v17 = vld [vmem:[#allocation4 + $0x170] sm:$0xff]  ;;  %v3262_v20 = vpack.c.bf16 %v389_v14, %v386_v13 }
  0x26   :  { %1888 = vmatmul.mubr.msk.f32.gmra.mrb[4].mxu0 %vm83_vm0, %v48_v40  ;;  %2470 = vmatpush3.bf16.msra.mxu1 %v3207_v49  ;;  %v52_v19 = vld [vmem:[%s3687_s0 + $0x30] sm:$0xff]  ;;  %v379_v24 = vld [vmem:[#allocation4 + $0xe8] sm:$0xff]  ;;  %v3265_v25 = vpack.c.bf16 %v396_v17, %v393_v15  ;;  %v53_v29 = vld [vmem:[%s3687_s0 + $0x38] sm:$0xff] }
  0x27   :  { %2447 = vmatpush1.bf16.msra.mxu0 %v3201_v41  ;;  %190 = vmatprep.mubr.f32.mxu0 %v3080_v0  ;;  %v376_v23 = vld [vmem:[#allocation4 + $0xd0] sm:$0xff]  ;;  %v395_v27 = vld [vmem:[#allocation4 + $0x168] sm:$0xff]  ;;  %v382_v32 = vld [vmem:[#allocation4 + $0x100] sm:$0xff] }
  0x28   :  { %2449 = vmatprep.subr.bf16.mxu0 %v3204_v44  ;;  %2471 = vmatprep.subr.bf16.mxu1 %v3081_v57  ;;  %v392_v26 = vld [vmem:[#allocation4 + $0x150] sm:$0xff]  ;;  %v3271_v28 = vpack.c.bf16 %v379_v24, %v376_v23  ;;  %v385_v34 = vld [vmem:[#allocation4 + $0x118] sm:$0xff]  ;;  %v391_v37 = vld [vmem:[#allocation4 + $0x148] sm:$0xff] }
  0x29   :  { %2096 = vmatprep.mubr.msk.f32.mxu1 %vm83_vm0, %v48_v40  ;;  %v3278_v31 = vpack.c.bf16 %v395_v27, %v392_v26  ;;  %v3285_v35 = vpack.c.bf16 %v385_v34, %v382_v32  ;;  %v388_v36 = vld [vmem:[#allocation4 + $0x130] sm:$0xff]  ;;  %v394_v39 = vld [vmem:[#allocation4 + $0x160] sm:$0xff]  ;;  %v397_v40 = vld [vmem:[#allocation4 + $0x178] sm:$0xff] }
  0x2a   :  { %1889 = vmatmul.mubr.msk.f32.gmra.mrb[6].mxu0 %vm83_vm0, %v49_v50  ;;  %2473 = vmatpush3.bf16.msra.mxu1 %v3223_v60  ;;  %v3295_v38 = vpack.c.bf16 %v391_v37, %v388_v36  ;;  %v3304_v42 = vpack.c.bf16 %v397_v40, %v394_v39  ;;  %v66_v47 = vld [vmem:[%s3690_s3] sm:$0x7] }
  0x2b   :  { %2451 = vmatpush1.bf16.msra.mxu0 %v3214_v51  ;;  %196 = vmatprep.mubr.f32.mxu0 %v3080_v0  ;;  %v79_v48 = vrot.slane %v66_v47, %v78_v46  ;;  %v3357_v11 = vrot.slane %v66_v47, %v74_v1  ;;  %v3368_v37 = vld [vmem:[%s3691_s4] ss:$0 sm:$0xff] }
  0x2c   :  { %2453 = vmatprep.subr.bf16.mxu0 %v3217_v54  ;;  %2474 = vmatprep.subr.bf16.mxu1 %v3081_v57 }
  0x2d   :  { %2097 = vmatmul.mubr.msk.f32.gmra.mrb[2].mxu1 %vm83_vm0, %v49_v50 }
  0x2e   :  { %1890 = vmatmul.mubr.msk.f32.gmra.mrb[8].mxu0 %vm83_vm0, %v50_v61  ;;  %2476 = vmatpush3.bf16.msra.mxu1 %v3239_v7 }
  0x2f   :  { %2455 = vmatpush1.bf16.msra.mxu0 %v3230_v62  ;;  %202 = vmatprep.mubr.f32.mxu0 %v3080_v0 }
  0x30   :  { %2457 = vmatprep.subr.bf16.mxu0 %v3233_v2  ;;  %2477 = vmatprep.subr.bf16.mxu1 %v3081_v57 }
  0x31   :  { %2099 = vmatprep.mubr.msk.f32.mxu1 %vm83_vm0, %v50_v61  ;;  %v70_v61 = vsub.s32 0, %v69_v45 }
  0x32   :  { %1891 = vmatmul.mubr.msk.f32.gmra.mrb[10].mxu0 %vm83_vm0, %v51_v8  ;;  %2479 = vmatpush3.bf16.msra.mxu1 %v3255_v18 }
  0x33   :  { %2459 = vmatpush1.bf16.msra.mxu0 %v3246_v9  ;;  %208 = vmatprep.mubr.f32.mxu0 %v3080_v0  ;;  %v3353_v5 = vrot.slane %v66_v47, %v70_v61 }
  0x34   :  { %2461 = vmatprep.subr.bf16.mxu0 %v3249_v12  ;;  %2480 = vmatprep.subr.bf16.mxu1 %v3081_v57 }
  0x35   :  { %2100 = vmatmul.mubr.msk.f32.gmra.mrb[4].mxu1 %vm83_vm0, %v51_v8 }
  0x36   :  { %1892 = vmatmul.mubr.msk.f32.gmra.mrb[12].mxu0 %vm83_vm0, %v52_v19  ;;  %2482 = vmatpush3.bf16.msra.mxu1 %v3271_v28 }
  0x37   :  { %2463 = vmatpush1.bf16.msra.mxu0 %v3262_v20  ;;  %214 = vmatprep.mubr.f32.mxu0 %v3080_v0 }
  0x38   :  { %2465 = vmatprep.subr.bf16.mxu0 %v3265_v25  ;;  %2483 = vmatprep.subr.bf16.mxu1 %v3081_v57 }
  0x39   :  { %2102 = vmatprep.mubr.msk.f32.mxu1 %vm83_vm0, %v52_v19 }
  0x3a   :  { %1893 = vmatmul.mubr.msk.f32.gmra.mrb[14].mxu0 %vm83_vm0, %v53_v29  ;;  %2103 = vmatmul.mubr.msk.f32.gmra.mrb[6].mxu1 %vm83_vm0, %v53_v29 }
  0x3b   :  { %2467 = vmatpush1.bf16.msra.mxu0 %v3278_v31  ;;  %476 = vmatprep.mubr.f32.mxu0 %v3080_v0 }
  0x3c   :  { %2493 = vmatprep.subr.bf16.mxu0 %v3165_v16  ;;  %2485 = vmatpush3.bf16.msra.mxu1 %v3285_v35 }
  0x3d   :  { %2486 = vmatprep.subr.bf16.mxu1 %v3081_v57  ;;  %2137 = vmatprep.mubr.msk.f32.mxu1 %vm3082_vm1, %v3080_v0 }
  0x3e   :  { %477 = vmatmul.mubr.f32.vlgmr.msra.gmra.mrb[0].mxu0 %v3080_v0 }
  0x3f   :  { %2495 = vmatpush1.bf16.msra.mxu0 %v3167_v21  ;;  %645 = vmatprep.mubr.f32.mxu0 %v3080_v0 }
  0x40   :  { %2497 = vmatprep.subr.bf16.mxu0 %v3170_v22  ;;  %2488 = vmatpush3.bf16.msra.mxu1 %v3295_v38 }
  0x41   :  { %2489 = vmatprep.subr.bf16.mxu1 %v3081_v57 }
  0x43   :  { %2499 = vmatpush1.bf16.msra.mxu0 %v3184_v30 }
  0x44   :  { %2501 = vmatprep.subr.bf16.mxu0 %v3187_v33  ;;  %2491 = vmatpush3.bf16.msra.mxu1 %v3304_v42 }
  0x45   :  { %2524 = vmatprep.subr.bf16.mxu1 %v3081_v57 }
  0x47   :  { %2503 = vmatpush1.bf16.msra.mxu0 %v3201_v41  ;;  %2138 = vmatmul.mubr.f32.vlgmr.msra.gmra.mrb[8].mxu1 %v3080_v0 }
  0x48   :  { %2505 = vmatprep.subr.bf16.mxu0 %v3204_v44  ;;  %2526 = vmatpush3.bf16.msra.mxu1 %v3207_v49 }
  0x49   :  { %2172 = vmatprep.mubr.msk.f32.mxu1 %vm3082_vm1, %v3080_v0  ;;  %2527 = vmatprep.subr.bf16.mxu1 %v3081_v57 }
  0x4b   :  { %2507 = vmatpush1.bf16.msra.mxu0 %v3214_v51 }
  0x4c   :  { %2509 = vmatprep.subr.bf16.mxu0 %v3217_v54  ;;  %2529 = vmatpush3.bf16.msra.mxu1 %v3223_v60 }
  0x4d   :  { %2530 = vmatprep.subr.bf16.mxu1 %v3081_v57 }
  0x4f   :  { %2511 = vmatpush1.bf16.msra.mxu0 %v3230_v62 }
  0x50   :  { %2513 = vmatprep.subr.bf16.mxu0 %v3233_v2  ;;  %2532 = vmatpush3.bf16.msra.mxu1 %v3239_v7 }
  0x51   :  { %2533 = vmatprep.subr.bf16.mxu1 %v3081_v57 }
  0x53   :  { %2515 = vmatpush1.bf16.msra.mxu0 %v3246_v9 }
  0x54   :  { %2517 = vmatprep.subr.bf16.mxu0 %v3249_v12  ;;  %2535 = vmatpush3.bf16.msra.mxu1 %v3255_v18 }
  0x55   :  { %2536 = vmatprep.subr.bf16.mxu1 %v3081_v57 }
  0x57   :  { %2519 = vmatpush1.bf16.msra.mxu0 %v3262_v20 }
  0x58   :  { %2521 = vmatprep.subr.bf16.mxu0 %v3265_v25  ;;  %2538 = vmatpush3.bf16.msra.mxu1 %v3271_v28 }
  0x59   :  { %2539 = vmatprep.subr.bf16.mxu1 %v3081_v57 }
  0x5b   :  { %2523 = vmatpush1.bf16.msra.mxu0 %v3278_v31 }
  0x5c   :  { %2549 = vmatprep.subr.bf16.mxu0 %v3165_v16  ;;  %2541 = vmatpush3.bf16.msra.mxu1 %v3285_v35 }
  0x5d   :  { %2542 = vmatprep.subr.bf16.mxu1 %v3081_v57 }
  0x60   :  { %2544 = vmatpush3.bf16.msra.mxu1 %v3295_v38 }
  0x61   :  { %2545 = vmatprep.subr.bf16.mxu1 %v3081_v57 }
  0x64   :  { %2547 = vmatpush3.bf16.msra.mxu1 %v3304_v42 }
  0x65   :  { %2580 = vmatprep.subr.bf16.mxu1 %v3081_v57 }
  0xf8   :  { %v2095_v50 = vpop.f32.mrb[0].mxu1 }
  0xf9   :  { %v3345_v52 = vadd.f32 %v2095_v50, %v79_v48  ;;  %v287_v53 = vpop.f32.mrb[1].mxu1 }
  0xfa   :  { %v288_v45 = vadd.f32 %v287_v53, %v79_v48 }
 0x100   :  { %v2098_v55 = vpop.f32.mrb[2].mxu1 }
 0x101   :  { %v3347_v56 = vadd.f32 %v2098_v55, %v79_v48  ;;  %v297_v58 = vpop.f32.mrb[3].mxu1 }
 0x102   :  { %v3349_v59 = vadd.f32 %v297_v58, %v79_v48 }
 0x108   :  { %v2101_v63 = vpop.f32.mrb[4].mxu1 }
 0x109   :  { %v3351_v3 = vadd.f32 %v2101_v63, %v79_v48  ;;  %v307_v4 = vpop.f32.mrb[5].mxu1 }
 0x10a   :  { %v3355_v6 = vadd.f32 %v307_v4, %v79_v48 }
 0x10d   :  { %v2104_v8 = vpop.f32.mrb[6].mxu1 }
 0x10e   :  { %v3359_v13 = vadd.f32 %v2104_v8, %v79_v48  ;;  %v317_v14 = vpop.f32.mrb[7].mxu1 }
 0x10f   :  { %v3362_v19 = vadd.f32 %v317_v14, %v79_v48 }
 0x111   :  { %v478_v10 = vpop.f32.mrb[0].mxu0 }
 0x112   :  { %v2908_v15 = vadd.f32 %v478_v10, %v3353_v5  ;;  %v480_v17 = vpop.f32.mrb[1].mxu0 }
 0x113   :  { %v2909_v24 = vadd.f32 %v480_v17, %v3357_v11 }
 0x114   :  { %v1903_v23 = vmul.f32 -1.442695, %v2908_v15 }
 0x115   :  { %v1904_v26 = vmul.f32 -1.442695, %v2909_v24 }
 0x116   :  { %2947 = vpow2.f32 %v1903_v23 }
 0x117   :  { %2949 = vpow2.f32 %v1904_v26 }
 0x11a   :  { %v549_v27 = vpop.f32.mrb[8].mxu1 }
 0x11b   :  { %v2139_v29 = vpop.f32.mrb[9].mxu1  ;;  %v567_v40 = vadd.f32 %v3368_v37, %v549_v27 }
 0x120   :  { %v2948_v32 = vpop.eup %2947 }
 0x121   :  { %v561_v34 = vadd.f32 1.0, %v2948_v32  ;;  %v2950_v36 = vpop.eup %2949 }
 0x122   :  { %v562_v39 = vadd.f32 1.0, %v2950_v36 }
 0x123   :  { %2951 = vrcp.f32 %v561_v34 }
 0x124   :  { %2953 = vrcp.f32 %v562_v39 }
 0x12d   :  { %v2952_v43 = vpop.eup %2951 }
 0x12e   :  { %v568_v46 = vmul.f32 %v2952_v43, %v567_v40  ;;  %v2954_v50 = vpop.eup %2953 }
 0x12f   :  { %v571_v55 = vsub.f32 1.0, %v2954_v50  ;;  %v573_v63 = vmul.f32 0.0, %v2954_v50 }
 0x130   :  { %v569_v47 = vadd.f32 %v568_v46, %v288_v45 }
 0x132   :  { %2955 = vtanh.f32 %v569_v47 }
 0x13c   :  { %v2956_v58 = vpop.eup %2955 }
 0x13d   :  { %v572_v61 = vmul.f32 %v2956_v58, %v571_v55 }
 0x13f   :  { %v574_v1 = vadd.f32 %v573_v63, %v572_v61 }
 0x141   :  { %646 = vmatmul.mubr.f32.vlgmr.msra.gmra.mrb[2].mxu0 %v574_v1  ;;  %2173 = vmatmul.mubr.f32.vlgmr.msra.gmra.mrb[10].mxu1 %v574_v1 }
 0x142   :  { %2551 = vmatpush1.bf16.msra.mxu0 %v3167_v21  ;;  %2582 = vmatpush3.bf16.msra.mxu1 %v3207_v49 }
 0x143   :  { %2553 = vmatprep.subr.bf16.mxu0 %v3170_v22  ;;  %2583 = vmatprep.subr.bf16.mxu1 %v3081_v57 }
 0x144   :  { %814 = vmatprep.mubr.f32.mxu0 %v3080_v0  ;;  %2207 = vmatprep.mubr.msk.f32.mxu1 %vm3082_vm1, %v3080_v0 }
 0x146   :  { %2555 = vmatpush1.bf16.msra.mxu0 %v3184_v30  ;;  %2585 = vmatpush3.bf16.msra.mxu1 %v3223_v60 }
 0x147   :  { %2557 = vmatprep.subr.bf16.mxu0 %v3187_v33  ;;  %2586 = vmatprep.subr.bf16.mxu1 %v3081_v57 }
 0x14a   :  { %2559 = vmatpush1.bf16.msra.mxu0 %v3201_v41  ;;  %2588 = vmatpush3.bf16.msra.mxu1 %v3239_v7 }
 0x14b   :  { %2561 = vmatprep.subr.bf16.mxu0 %v3204_v44  ;;  %2589 = vmatprep.subr.bf16.mxu1 %v3081_v57 }
 0x14e   :  { %2563 = vmatpush1.bf16.msra.mxu0 %v3214_v51  ;;  %2591 = vmatpush3.bf16.msra.mxu1 %v3255_v18 }
 0x14f   :  { %2565 = vmatprep.subr.bf16.mxu0 %v3217_v54  ;;  %2592 = vmatprep.subr.bf16.mxu1 %v3081_v57 }
 0x152   :  { %2567 = vmatpush1.bf16.msra.mxu0 %v3230_v62  ;;  %2594 = vmatpush3.bf16.msra.mxu1 %v3271_v28 }
 0x153   :  { %2569 = vmatprep.subr.bf16.mxu0 %v3233_v2  ;;  %2595 = vmatprep.subr.bf16.mxu1 %v3081_v57 }
 0x156   :  { %2571 = vmatpush1.bf16.msra.mxu0 %v3246_v9  ;;  %2597 = vmatpush3.bf16.msra.mxu1 %v3285_v35 }
 0x157   :  { %2573 = vmatprep.subr.bf16.mxu0 %v3249_v12  ;;  %2598 = vmatprep.subr.bf16.mxu1 %v3081_v57 }
 0x15a   :  { %2575 = vmatpush1.bf16.msra.mxu0 %v3262_v20  ;;  %2600 = vmatpush3.bf16.msra.mxu1 %v3295_v38 }
 0x15b   :  { %2577 = vmatprep.subr.bf16.mxu0 %v3265_v25  ;;  %2601 = vmatprep.subr.bf16.mxu1 %v3081_v57 }
 0x15e   :  { %2579 = vmatpush1.bf16.msra.mxu0 %v3278_v31  ;;  %2603 = vmatpush3.bf16.msra.mxu1 %v3304_v42 }
 0x15f   :  { %2605 = vmatprep.subr.bf16.mxu0 %v3165_v16  ;;  %2636 = vmatprep.subr.bf16.mxu1 %v3081_v57 }
 0x214   :  { %v647_v48 = vpop.f32.mrb[2].mxu0  ;;  %v718_v53 = vpop.f32.mrb[10].mxu1 }
 0x215   :  { %v2910_v4 = vadd.f32 %v647_v48, %v3353_v5  ;;  %v649_v8 = vpop.f32.mrb[3].mxu0  ;;  %v2174_v10 = vpop.f32.mrb[11].mxu1  ;;  %v736_v29 = vadd.f32 %v3368_v37, %v718_v53 }
 0x216   :  { %v2911_v15 = vadd.f32 %v649_v8, %v3357_v11 }
 0x217   :  { %v1905_v14 = vmul.f32 -1.442695, %v2910_v4 }
 0x218   :  { %v1906_v17 = vmul.f32 -1.442695, %v2911_v15 }
 0x219   :  { %2957 = vpow2.f32 %v1905_v14 }
 0x21a   :  { %2959 = vpow2.f32 %v1906_v17 }
 0x223   :  { %v2958_v23 = vpop.eup %2957 }
 0x224   :  { %v730_v24 = vadd.f32 1.0, %v2958_v23  ;;  %v2960_v26 = vpop.eup %2959 }
 0x225   :  { %v731_v27 = vadd.f32 1.0, %v2960_v26 }
 0x226   :  { %2961 = vrcp.f32 %v730_v24 }
 0x227   :  { %2963 = vrcp.f32 %v731_v27 }
 0x230   :  { %v2962_v32 = vpop.eup %2961 }
 0x231   :  { %v737_v34 = vmul.f32 %v2962_v32, %v736_v29  ;;  %v2964_v39 = vpop.eup %2963 }
 0x232   :  { %v740_v40 = vsub.f32 1.0, %v2964_v39  ;;  %v742_v46 = vmul.f32 %v2964_v39, %v574_v1 }
 0x233   :  { %v738_v36 = vadd.f32 %v737_v34, %v3345_v52 }
 0x235   :  { %2965 = vtanh.f32 %v738_v36 }
 0x23f   :  { %v2966_v43 = vpop.eup %2965 }
 0x240   :  { %v741_v45 = vmul.f32 %v2966_v43, %v740_v40 }
 0x242   :  { %v743_v47 = vadd.f32 %v742_v46, %v741_v45 }
 0x244   :  { %815 = vmatmul.mubr.f32.vlgmr.msra.gmra.mrb[4].mxu0 %v743_v47  ;;  %2208 = vmatmul.mubr.f32.vlgmr.msra.gmra.mrb[12].mxu1 %v743_v47 }
 0x245   :  { %2607 = vmatpush1.bf16.msra.mxu0 %v3167_v21  ;;  %2638 = vmatpush3.bf16.msra.mxu1 %v3207_v49 }
 0x246   :  { %2609 = vmatprep.subr.bf16.mxu0 %v3170_v22  ;;  %2639 = vmatprep.subr.bf16.mxu1 %v3081_v57 }
 0x247   :  { %983 = vmatprep.mubr.f32.mxu0 %v3080_v0  ;;  %2242 = vmatprep.mubr.msk.f32.mxu1 %vm3082_vm1, %v3080_v0 }
 0x249   :  { %2611 = vmatpush1.bf16.msra.mxu0 %v3184_v30  ;;  %2641 = vmatpush3.bf16.msra.mxu1 %v3223_v60 }
 0x24a   :  { %2613 = vmatprep.subr.bf16.mxu0 %v3187_v33  ;;  %2642 = vmatprep.subr.bf16.mxu1 %v3081_v57 }
 0x24d   :  { %2615 = vmatpush1.bf16.msra.mxu0 %v3201_v41  ;;  %2644 = vmatpush3.bf16.msra.mxu1 %v3239_v7 }
 0x24e   :  { %2617 = vmatprep.subr.bf16.mxu0 %v3204_v44  ;;  %2645 = vmatprep.subr.bf16.mxu1 %v3081_v57 }
 0x251   :  { %2619 = vmatpush1.bf16.msra.mxu0 %v3214_v51  ;;  %2647 = vmatpush3.bf16.msra.mxu1 %v3255_v18 }
 0x252   :  { %2621 = vmatprep.subr.bf16.mxu0 %v3217_v54  ;;  %2648 = vmatprep.subr.bf16.mxu1 %v3081_v57 }
 0x255   :  { %2623 = vmatpush1.bf16.msra.mxu0 %v3230_v62  ;;  %2650 = vmatpush3.bf16.msra.mxu1 %v3271_v28 }
 0x256   :  { %2625 = vmatprep.subr.bf16.mxu0 %v3233_v2  ;;  %2651 = vmatprep.subr.bf16.mxu1 %v3081_v57 }
 0x259   :  { %2627 = vmatpush1.bf16.msra.mxu0 %v3246_v9  ;;  %2653 = vmatpush3.bf16.msra.mxu1 %v3285_v35 }
 0x25a   :  { %2629 = vmatprep.subr.bf16.mxu0 %v3249_v12  ;;  %2654 = vmatprep.subr.bf16.mxu1 %v3081_v57 }
 0x25d   :  { %2631 = vmatpush1.bf16.msra.mxu0 %v3262_v20  ;;  %2656 = vmatpush3.bf16.msra.mxu1 %v3295_v38 }
 0x25e   :  { %2633 = vmatprep.subr.bf16.mxu0 %v3265_v25  ;;  %2657 = vmatprep.subr.bf16.mxu1 %v3081_v57 }
 0x261   :  { %2635 = vmatpush1.bf16.msra.mxu0 %v3278_v31  ;;  %2659 = vmatpush3.bf16.msra.mxu1 %v3304_v42 }
 0x262   :  { %2661 = vmatprep.subr.bf16.mxu0 %v3165_v16  ;;  %2692 = vmatprep.subr.bf16.mxu1 %v3081_v57 }
 0x317   :  { %v816_v52 = vpop.f32.mrb[4].mxu0  ;;  %v887_v50 = vpop.f32.mrb[12].mxu1 }
 0x318   :  { %v2912_v55 = vadd.f32 %v816_v52, %v3353_v5  ;;  %v818_v58 = vpop.f32.mrb[5].mxu0  ;;  %v2209_v61 = vpop.f32.mrb[13].mxu1  ;;  %v905_v14 = vadd.f32 %v3368_v37, %v887_v50 }
 0x319   :  { %v2913_v1 = vadd.f32 %v818_v58, %v3357_v11 }
 0x31a   :  { %v1907_v63 = vmul.f32 -1.442695, %v2912_v55 }
 0x31b   :  { %v1908_v48 = vmul.f32 -1.442695, %v2913_v1 }
 0x31c   :  { %2967 = vpow2.f32 %v1907_v63 }
 0x31d   :  { %2969 = vpow2.f32 %v1908_v48 }
 0x326   :  { %v2968_v53 = vpop.eup %2967 }
 0x327   :  { %v899_v4 = vadd.f32 1.0, %v2968_v53  ;;  %v2970_v8 = vpop.eup %2969 }
 0x328   :  { %v900_v10 = vadd.f32 1.0, %v2970_v8 }
 0x329   :  { %2971 = vrcp.f32 %v899_v4 }
 0x32a   :  { %2973 = vrcp.f32 %v900_v10 }
 0x333   :  { %v2972_v15 = vpop.eup %2971 }
 0x334   :  { %v906_v17 = vmul.f32 %v2972_v15, %v905_v14  ;;  %v2974_v24 = vpop.eup %2973 }
 0x335   :  { %v909_v26 = vsub.f32 1.0, %v2974_v24  ;;  %v911_v32 = vmul.f32 %v2974_v24, %v743_v47 }
 0x336   :  { %v907_v23 = vadd.f32 %v906_v17, %v3349_v59 }
 0x338   :  { %2975 = vtanh.f32 %v907_v23 }
 0x342   :  { %v2976_v27 = vpop.eup %2975 }
 0x343   :  { %v910_v29 = vmul.f32 %v2976_v27, %v909_v26 }
 0x345   :  { %v912_v34 = vadd.f32 %v911_v32, %v910_v29 }
 0x347   :  { %984 = vmatmul.mubr.f32.vlgmr.msra.gmra.mrb[6].mxu0 %v912_v34  ;;  %2243 = vmatmul.mubr.f32.vlgmr.msra.gmra.mrb[14].mxu1 %v912_v34 }
 0x348   :  { %2663 = vmatpush1.bf16.msra.mxu0 %v3167_v21  ;;  %2694 = vmatpush3.bf16.msra.mxu1 %v3207_v49 }
 0x349   :  { %2665 = vmatprep.subr.bf16.mxu0 %v3170_v22  ;;  %2695 = vmatprep.subr.bf16.mxu1 %v3081_v57 }
 0x34a   :  { %1152 = vmatprep.mubr.f32.mxu0 %v3080_v0  ;;  %2277 = vmatprep.mubr.msk.f32.mxu1 %vm3082_vm1, %v3080_v0 }
 0x34c   :  { %2667 = vmatpush1.bf16.msra.mxu0 %v3184_v30  ;;  %2697 = vmatpush3.bf16.msra.mxu1 %v3223_v60 }
 0x34d   :  { %2669 = vmatprep.subr.bf16.mxu0 %v3187_v33  ;;  %2698 = vmatprep.subr.bf16.mxu1 %v3081_v57 }
 0x350   :  { %2671 = vmatpush1.bf16.msra.mxu0 %v3201_v41  ;;  %2700 = vmatpush3.bf16.msra.mxu1 %v3239_v7 }
 0x351   :  { %2673 = vmatprep.subr.bf16.mxu0 %v3204_v44  ;;  %2701 = vmatprep.subr.bf16.mxu1 %v3081_v57 }
 0x354   :  { %2675 = vmatpush1.bf16.msra.mxu0 %v3214_v51  ;;  %2703 = vmatpush3.bf16.msra.mxu1 %v3255_v18 }
 0x355   :  { %2677 = vmatprep.subr.bf16.mxu0 %v3217_v54  ;;  %2704 = vmatprep.subr.bf16.mxu1 %v3081_v57 }
 0x358   :  { %2679 = vmatpush1.bf16.msra.mxu0 %v3230_v62  ;;  %2706 = vmatpush3.bf16.msra.mxu1 %v3271_v28 }
 0x359   :  { %2681 = vmatprep.subr.bf16.mxu0 %v3233_v2  ;;  %2707 = vmatprep.subr.bf16.mxu1 %v3081_v57 }
 0x35c   :  { %2683 = vmatpush1.bf16.msra.mxu0 %v3246_v9  ;;  %2709 = vmatpush3.bf16.msra.mxu1 %v3285_v35 }
 0x35d   :  { %2685 = vmatprep.subr.bf16.mxu0 %v3249_v12  ;;  %2710 = vmatprep.subr.bf16.mxu1 %v3081_v57 }
 0x360   :  { %2687 = vmatpush1.bf16.msra.mxu0 %v3262_v20  ;;  %2712 = vmatpush3.bf16.msra.mxu1 %v3295_v38 }
 0x361   :  { %2689 = vmatprep.subr.bf16.mxu0 %v3265_v25  ;;  %2713 = vmatprep.subr.bf16.mxu1 %v3081_v57 }
 0x364   :  { %2691 = vmatpush1.bf16.msra.mxu0 %v3278_v31  ;;  %2715 = vmatpush3.bf16.msra.mxu1 %v3304_v42 }
 0x365   :  { %2717 = vmatprep.subr.bf16.mxu0 %v3165_v16  ;;  %2748 = vmatprep.subr.bf16.mxu1 %v3081_v57 }
 0x41a   :  { %v985_v59 = vpop.f32.mrb[6].mxu0  ;;  %v1056_v36 = vpop.f32.mrb[14].mxu1 }
 0x41b   :  { %v2914_v39 = vadd.f32 %v985_v59, %v3353_v5  ;;  %v987_v40 = vpop.f32.mrb[7].mxu0  ;;  %v2244_v43 = vpop.f32.mrb[15].mxu1  ;;  %v1074_v61 = vadd.f32 %v3368_v37, %v1056_v36 }
 0x41c   :  { %v2915_v46 = vadd.f32 %v987_v40, %v3357_v11 }
 0x41d   :  { %v1909_v45 = vmul.f32 -1.442695, %v2914_v39 }
 0x41e   :  { %v1910_v47 = vmul.f32 -1.442695, %v2915_v46 }
 0x41f   :  { %2977 = vpow2.f32 %v1909_v45 }
 0x420   :  { %2979 = vpow2.f32 %v1910_v47 }
 0x429   :  { %v2978_v52 = vpop.eup %2977 }
 0x42a   :  { %v1068_v50 = vadd.f32 1.0, %v2978_v52  ;;  %v2980_v55 = vpop.eup %2979 }
 0x42b   :  { %v1069_v58 = vadd.f32 1.0, %v2980_v55 }
 0x42c   :  { %2981 = vrcp.f32 %v1068_v50 }
 0x42d   :  { %2983 = vrcp.f32 %v1069_v58 }
 0x436   :  { %v2982_v63 = vpop.eup %2981 }
 0x437   :  { %v1075_v1 = vmul.f32 %v2982_v63, %v1074_v61  ;;  %v2984_v53 = vpop.eup %2983 }
 0x438   :  { %v1078_v4 = vsub.f32 1.0, %v2984_v53  ;;  %v1080_v14 = vmul.f32 %v2984_v53, %v912_v34 }
 0x439   :  { %v1076_v48 = vadd.f32 %v1075_v1, %v3347_v56 }
 0x43b   :  { %2985 = vtanh.f32 %v1076_v48 }
 0x445   :  { %v2986_v8 = vpop.eup %2985 }
 0x446   :  { %v1079_v10 = vmul.f32 %v2986_v8, %v1078_v4 }
 0x448   :  { %v1081_v15 = vadd.f32 %v1080_v14, %v1079_v10 }
 0x44a   :  { %1153 = vmatmul.mubr.f32.vlgmr.msra.gmra.mrb[8].mxu0 %v1081_v15  ;;  %2278 = vmatmul.mubr.f32.vlgmr.msra.gmra.mrb[16].mxu1 %v1081_v15 }
 0x44b   :  { %2719 = vmatpush1.bf16.msra.mxu0 %v3167_v21  ;;  %2750 = vmatpush3.bf16.msra.mxu1 %v3207_v49 }
 0x44c   :  { %2721 = vmatprep.subr.bf16.mxu0 %v3170_v22  ;;  %2751 = vmatprep.subr.bf16.mxu1 %v3081_v57 }
 0x44d   :  { %1321 = vmatprep.mubr.f32.mxu0 %v3080_v0  ;;  %2312 = vmatprep.mubr.msk.f32.mxu1 %vm3082_vm1, %v3080_v0 }
 0x44f   :  { %2723 = vmatpush1.bf16.msra.mxu0 %v3184_v30  ;;  %2753 = vmatpush3.bf16.msra.mxu1 %v3223_v60 }
 0x450   :  { %2725 = vmatprep.subr.bf16.mxu0 %v3187_v33  ;;  %2754 = vmatprep.subr.bf16.mxu1 %v3081_v57 }
 0x453   :  { %2727 = vmatpush1.bf16.msra.mxu0 %v3201_v41  ;;  %2756 = vmatpush3.bf16.msra.mxu1 %v3239_v7 }
 0x454   :  { %2729 = vmatprep.subr.bf16.mxu0 %v3204_v44  ;;  %2757 = vmatprep.subr.bf16.mxu1 %v3081_v57 }
 0x457   :  { %2731 = vmatpush1.bf16.msra.mxu0 %v3214_v51  ;;  %2759 = vmatpush3.bf16.msra.mxu1 %v3255_v18 }
 0x458   :  { %2733 = vmatprep.subr.bf16.mxu0 %v3217_v54  ;;  %2760 = vmatprep.subr.bf16.mxu1 %v3081_v57 }
 0x45b   :  { %2735 = vmatpush1.bf16.msra.mxu0 %v3230_v62  ;;  %2762 = vmatpush3.bf16.msra.mxu1 %v3271_v28 }
 0x45c   :  { %2737 = vmatprep.subr.bf16.mxu0 %v3233_v2  ;;  %2763 = vmatprep.subr.bf16.mxu1 %v3081_v57 }
 0x45f   :  { %2739 = vmatpush1.bf16.msra.mxu0 %v3246_v9  ;;  %2765 = vmatpush3.bf16.msra.mxu1 %v3285_v35 }
 0x460   :  { %2741 = vmatprep.subr.bf16.mxu0 %v3249_v12  ;;  %2766 = vmatprep.subr.bf16.mxu1 %v3081_v57 }
 0x463   :  { %2743 = vmatpush1.bf16.msra.mxu0 %v3262_v20  ;;  %2768 = vmatpush3.bf16.msra.mxu1 %v3295_v38 }
 0x464   :  { %2745 = vmatprep.subr.bf16.mxu0 %v3265_v25  ;;  %2769 = vmatprep.subr.bf16.mxu1 %v3081_v57 }
 0x467   :  { %2747 = vmatpush1.bf16.msra.mxu0 %v3278_v31  ;;  %2771 = vmatpush3.bf16.msra.mxu1 %v3304_v42 }
 0x468   :  { %2773 = vmatprep.subr.bf16.mxu0 %v3165_v16  ;;  %2804 = vmatprep.subr.bf16.mxu1 %v3081_v57 }
 0x51d   :  { %v1154_v56 = vpop.f32.mrb[8].mxu0  ;;  %v1225_v17 = vpop.f32.mrb[16].mxu1 }
 0x51e   :  { %v2916_v23 = vadd.f32 %v1154_v56, %v3353_v5  ;;  %v1156_v24 = vpop.f32.mrb[9].mxu0  ;;  %v2279_v26 = vpop.f32.mrb[17].mxu1  ;;  %v1243_v40 = vadd.f32 %v3368_v37, %v1225_v17 }
 0x51f   :  { %v2917_v29 = vadd.f32 %v1156_v24, %v3357_v11 }
 0x520   :  { %v1911_v27 = vmul.f32 -1.442695, %v2916_v23 }
 0x521   :  { %v1912_v32 = vmul.f32 -1.442695, %v2917_v29 }
 0x522   :  { %2987 = vpow2.f32 %v1911_v27 }
 0x523   :  { %2989 = vpow2.f32 %v1912_v32 }
 0x52c   :  { %v2988_v34 = vpop.eup %2987 }
 0x52d   :  { %v1237_v59 = vadd.f32 1.0, %v2988_v34  ;;  %v2990_v36 = vpop.eup %2989 }
 0x52e   :  { %v1238_v39 = vadd.f32 1.0, %v2990_v36 }
 0x52f   :  { %2991 = vrcp.f32 %v1237_v59 }
 0x530   :  { %2993 = vrcp.f32 %v1238_v39  ;;  %v1765_v39 = vld [vmem:[%s3692_s5 + $0x10] sm:$0xff] }
 0x539   :  { %v2992_v43 = vpop.eup %2991 }
 0x53a   :  { %v1244_v45 = vmul.f32 %v2992_v43, %v1243_v40  ;;  %v2994_v47 = vpop.eup %2993  ;;  %v1767_v43 = vld [vmem:[%s3692_s5 + $0x20] sm:$0xff] }
 0x53b   :  { %v1247_v52 = vsub.f32 1.0, %v2994_v47  ;;  %v1249_v58 = vmul.f32 %v2994_v47, %v1081_v15  ;;  %v1769_v47 = vld [vmem:[%s3692_s5 + $0x30] sm:$0xff] }
 0x53c   :  { %v1245_v46 = vadd.f32 %v1244_v45, %v3355_v6  ;;  %v1768_v45 = vld [vmem:[%s3692_s5 + $0x28] sm:$0xff] }
 0x53e   :  { %2995 = vtanh.f32 %v1245_v46  ;;  %v2891_v46 = vpack.c.bf16 %v1768_v45, %v1767_v43 }
 0x548   :  { %v2996_v50 = vpop.eup %2995 }
 0x549   :  { %v1248_v55 = vmul.f32 %v2996_v50, %v1247_v52  ;;  %v1770_v52 = vld [vmem:[%s3692_s5 + $0x38] sm:$0xff] }
 0x54a   :  { %v2894_v50 = vpack.c.bf16 %v1770_v52, %v1769_v47 }
 0x54b   :  { %v1250_v61 = vadd.f32 %v1249_v58, %v1248_v55  ;;  %v1771_v55 = vld [vmem:[%s3692_s5 + $0x40] sm:$0xff]  ;;  %v1772_v58 = vld [vmem:[%s3692_s5 + $0x48] sm:$0xff] }
 0x54d   :  { %1322 = vmatmul.mubr.f32.vlgmr.msra.gmra.mrb[10].mxu0 %v1250_v61  ;;  %2313 = vmatmul.mubr.f32.vlgmr.msra.gmra.mrb[18].mxu1 %v1250_v61 }
 0x54e   :  { %2775 = vmatpush1.bf16.msra.mxu0 %v3167_v21  ;;  %2806 = vmatpush3.bf16.msra.mxu1 %v3207_v49 }
 0x54f   :  { %2777 = vmatprep.subr.bf16.mxu0 %v3170_v22  ;;  %2807 = vmatprep.subr.bf16.mxu1 %v3081_v57 }
 0x550   :  { %1490 = vmatprep.mubr.f32.mxu0 %v3080_v0  ;;  %2347 = vmatprep.mubr.msk.f32.mxu1 %vm3082_vm1, %v3080_v0 }
 0x552   :  { %2779 = vmatpush1.bf16.msra.mxu0 %v3184_v30  ;;  %2809 = vmatpush3.bf16.msra.mxu1 %v3223_v60 }
 0x553   :  { %2781 = vmatprep.subr.bf16.mxu0 %v3187_v33  ;;  %2810 = vmatprep.subr.bf16.mxu1 %v3081_v57 }
 0x556   :  { %2783 = vmatpush1.bf16.msra.mxu0 %v3201_v41  ;;  %2812 = vmatpush3.bf16.msra.mxu1 %v3239_v7 }
 0x557   :  { %2785 = vmatprep.subr.bf16.mxu0 %v3204_v44  ;;  %2813 = vmatprep.subr.bf16.mxu1 %v3081_v57 }
 0x55a   :  { %2787 = vmatpush1.bf16.msra.mxu0 %v3214_v51  ;;  %2815 = vmatpush3.bf16.msra.mxu1 %v3255_v18 }
 0x55b   :  { %2789 = vmatprep.subr.bf16.mxu0 %v3217_v54  ;;  %2816 = vmatprep.subr.bf16.mxu1 %v3081_v57 }
 0x55e   :  { %2791 = vmatpush1.bf16.msra.mxu0 %v3230_v62  ;;  %2818 = vmatpush3.bf16.msra.mxu1 %v3271_v28 }
 0x55f   :  { %2793 = vmatprep.subr.bf16.mxu0 %v3233_v2  ;;  %2819 = vmatprep.subr.bf16.mxu1 %v3081_v57 }
 0x562   :  { %2795 = vmatpush1.bf16.msra.mxu0 %v3246_v9  ;;  %2821 = vmatpush3.bf16.msra.mxu1 %v3285_v35 }
 0x563   :  { %2797 = vmatprep.subr.bf16.mxu0 %v3249_v12  ;;  %2822 = vmatprep.subr.bf16.mxu1 %v3081_v57 }
 0x566   :  { %2799 = vmatpush1.bf16.msra.mxu0 %v3262_v20  ;;  %2824 = vmatpush3.bf16.msra.mxu1 %v3295_v38 }
 0x567   :  { %2801 = vmatprep.subr.bf16.mxu0 %v3265_v25  ;;  %2825 = vmatprep.subr.bf16.mxu1 %v3081_v57 }
 0x56a   :  { %2803 = vmatpush1.bf16.msra.mxu0 %v3278_v31  ;;  %2827 = vmatpush3.bf16.msra.mxu1 %v3304_v42 }
 0x56b   :  { %2829 = vmatprep.subr.bf16.mxu0 %v3165_v16  ;;  %2860 = vmatprep.subr.bf16.mxu1 %v3081_v57 }
 0x620   :  { %v1323_v6 = vpop.f32.mrb[10].mxu0  ;;  %v1394_v63 = vpop.f32.mrb[18].mxu1 }
 0x621   :  { %v2918_v1 = vadd.f32 %v1323_v6, %v3353_v5  ;;  %v1325_v48 = vpop.f32.mrb[11].mxu0  ;;  %v2314_v53 = vpop.f32.mrb[19].mxu1  ;;  %v1412_v16 = vadd.f32 %v3368_v37, %v1394_v63  ;;  %v1773_v6 = vld [vmem:[%s3692_s5 + $0x50] sm:$0xff]  ;;  %v1774_v63 = vld [vmem:[%s3692_s5 + $0x58] sm:$0xff] }
 0x622   :  { %v2919_v8 = vadd.f32 %v1325_v48, %v3357_v11  ;;  %v1775_v48 = vld [vmem:[%s3692_s5 + $0x60] sm:$0xff]  ;;  %v1776_v53 = vld [vmem:[%s3692_s5 + $0x68] sm:$0xff] }
 0x623   :  { %v1913_v4 = vmul.f32 -1.442695, %v2918_v1  ;;  %v2900_v1 = vpack.c.bf16 %v1774_v63, %v1773_v6 }
 0x624   :  { %v1914_v10 = vmul.f32 -1.442695, %v2919_v8  ;;  %v1777_v8 = vld [vmem:[%s3692_s5 + $0x70] sm:$0xff] }
 0x625   :  { %2997 = vpow2.f32 %v1913_v4  ;;  %v2903_v4 = vpack.c.bf16 %v1776_v53, %v1775_v48 }
 0x626   :  { %2999 = vpow2.f32 %v1914_v10  ;;  %v1778_v10 = vld [vmem:[%s3692_s5 + $0x78] sm:$0xff] }
 0x62f   :  { %v2998_v14 = vpop.eup %2997 }
 0x630   :  { %v1406_v15 = vadd.f32 1.0, %v2998_v14  ;;  %v3000_v56 = vpop.eup %2999  ;;  %v2906_v14 = vpack.c.bf16 %v1778_v10, %v1777_v8 }
 0x631   :  { %v1407_v17 = vadd.f32 1.0, %v3000_v56 }
 0x632   :  { %3001 = vrcp.f32 %v1406_v15 }
 0x633   :  { %3003 = vrcp.f32 %v1407_v17 }
 0x63c   :  { %v3002_v23 = vpop.eup %3001 }
 0x63d   :  { %v1413_v24 = vmul.f32 %v3002_v23, %v1412_v16  ;;  %v3004_v27 = vpop.eup %3003 }
 0x63e   :  { %v1416_v29 = vsub.f32 1.0, %v3004_v27  ;;  %v1418_v59 = vmul.f32 %v3004_v27, %v1250_v61  ;;  %v2897_v61 = vpack.c.bf16 %v1772_v58, %v1771_v55 }
 0x63f   :  { %v1414_v26 = vadd.f32 %v1413_v24, %v3351_v3  ;;  %v1764_v3 = vld [vmem:[%s3692_s5 + $0x8] sm:$0xff] }
 0x641   :  { %3005 = vtanh.f32 %v1414_v26 }
 0x64b   :  { %v3006_v32 = vpop.eup %3005 }
 0x64c   :  { %v1417_v34 = vmul.f32 %v3006_v32, %v1416_v29 }
 0x64e   :  { %v1419_v36 = vadd.f32 %v1418_v59, %v1417_v34 }
 0x650   :  { %1491 = vmatmul.mubr.f32.vlgmr.msra.gmra.mrb[12].mxu0 %v1419_v36  ;;  %2348 = vmatmul.mubr.f32.vlgmr.msra.gmra.mrb[20].mxu1 %v1419_v36 }
 0x651   :  { %2831 = vmatpush1.bf16.msra.mxu0 %v3167_v21  ;;  %2862 = vmatpush3.bf16.msra.mxu1 %v3207_v49 }
 0x652   :  { %2833 = vmatprep.subr.bf16.mxu0 %v3170_v22  ;;  %2863 = vmatprep.subr.bf16.mxu1 %v3081_v57 }
 0x653   :  { %1659 = vmatprep.mubr.f32.mxu0 %v3080_v0  ;;  %2382 = vmatprep.mubr.msk.f32.mxu1 %vm3082_vm1, %v3080_v0 }
 0x655   :  { %2835 = vmatpush1.bf16.msra.mxu0 %v3184_v30  ;;  %2865 = vmatpush3.bf16.msra.mxu1 %v3223_v60 }
 0x656   :  { %2837 = vmatprep.subr.bf16.mxu0 %v3187_v33  ;;  %2866 = vmatprep.subr.bf16.mxu1 %v3081_v57 }
 0x659   :  { %2839 = vmatpush1.bf16.msra.mxu0 %v3201_v41  ;;  %2868 = vmatpush3.bf16.msra.mxu1 %v3239_v7 }
 0x65a   :  { %2841 = vmatprep.subr.bf16.mxu0 %v3204_v44  ;;  %2869 = vmatprep.subr.bf16.mxu1 %v3081_v57 }
 0x65d   :  { %2843 = vmatpush1.bf16.msra.mxu0 %v3214_v51  ;;  %2871 = vmatpush3.bf16.msra.mxu1 %v3255_v18 }
 0x65e   :  { %2845 = vmatprep.subr.bf16.mxu0 %v3217_v54  ;;  %2872 = vmatprep.subr.bf16.mxu1 %v3081_v57 }
 0x661   :  { %2847 = vmatpush1.bf16.msra.mxu0 %v3230_v62  ;;  %2874 = vmatpush3.bf16.msra.mxu1 %v3271_v28 }
 0x662   :  { %2849 = vmatprep.subr.bf16.mxu0 %v3233_v2  ;;  %2875 = vmatprep.subr.bf16.mxu1 %v3081_v57 }
 0x665   :  { %2851 = vmatpush1.bf16.msra.mxu0 %v3246_v9  ;;  %2877 = vmatpush3.bf16.msra.mxu1 %v3285_v35 }
 0x666   :  { %2853 = vmatprep.subr.bf16.mxu0 %v3249_v12  ;;  %2878 = vmatprep.subr.bf16.mxu1 %v3081_v57 }
 0x669   :  { %2855 = vmatpush1.bf16.msra.mxu0 %v3262_v20  ;;  %2880 = vmatpush3.bf16.msra.mxu1 %v3295_v38 }
 0x66a   :  { %2857 = vmatprep.subr.bf16.mxu0 %v3265_v25  ;;  %2881 = vmatprep.subr.bf16.mxu1 %v3081_v57 }
 0x66d   :  { %2859 = vmatpush1.bf16.msra.mxu0 %v3278_v31  ;;  %2883 = vmatpush3.bf16.msra.mxu1 %v3304_v42  ;;  %v1763_v42 = vld [vmem:[%s3692_s5] sm:$0xff] }
 0x66e   :  { %2884 = vmatprep.subr.bf16.mxu0 %v3081_v57 }
 0x723   :  { %v1492_v21 = vpop.f32.mrb[12].mxu0  ;;  %v1563_v22 = vpop.f32.mrb[20].mxu1 }
 0x724   :  { %v2920_v30 = vadd.f32 %v1492_v21, %v3353_v5  ;;  %v1494_v33 = vpop.f32.mrb[13].mxu0  ;;  %v2349_v41 = vpop.f32.mrb[21].mxu1  ;;  %v1581_v7 = vadd.f32 %v3368_v37, %v1563_v22 }
 0x725   :  { %v2921_v49 = vadd.f32 %v1494_v33, %v3357_v11 }
 0x726   :  { %v1915_v44 = vmul.f32 -1.442695, %v2920_v30 }
 0x727   :  { %v1916_v51 = vmul.f32 -1.442695, %v2921_v49  ;;  %v1919_v49 = vld [vmem:[%s3693_s6] ss:$0 sm:$0xff] }
 0x728   :  { %3007 = vpow2.f32 %v1915_v44 }
 0x729   :  { %3009 = vpow2.f32 %v1916_v51 }
 0x732   :  { %v3008_v54 = vpop.eup %3007 }
 0x733   :  { %v1575_v60 = vadd.f32 1.0, %v3008_v54  ;;  %v3010_v62 = vpop.eup %3009 }
 0x734   :  { %v1576_v2 = vadd.f32 1.0, %v3010_v62 }
 0x735   :  { %3011 = vrcp.f32 %v1575_v60 }
 0x736   :  { %3013 = vrcp.f32 %v1576_v2 }
 0x73f   :  { %v3012_v9 = vpop.eup %3011 }
 0x740   :  { %v1582_v12 = vmul.f32 %v3012_v9, %v1581_v7  ;;  %v3014_v20 = vpop.eup %3013 }
 0x741   :  { %v1585_v25 = vsub.f32 1.0, %v3014_v20  ;;  %v1587_v35 = vmul.f32 %v3014_v20, %v1419_v36 }
 0x742   :  { %v1583_v18 = vadd.f32 %v1582_v12, %v3362_v19  ;;  %v2885_v19 = vpack.c.bf16 %v1764_v3, %v1763_v42 }
 0x744   :  { %3015 = vtanh.f32 %v1583_v18 }
 0x74e   :  { %v3016_v28 = vpop.eup %3015 }
 0x74f   :  { %v1586_v31 = vmul.f32 %v3016_v28, %v1585_v25 }
 0x751   :  { %v3604_v38 = vadd.f32 %v1587_v35, %v1586_v31 }
 0x753   :  { %1660 = vmatmul.mubr.f32.vlgmr.msra.gmra.mrb[14].mxu0 %v3604_v38  ;;  %2383 = vmatmul.mubr.f32.vlgmr.msra.gmra.mrb[22].mxu1 %v3604_v38 }
 0x754   :  { %2417 = vmatprep.mubr.msk.f32.mxu0 %vm3082_vm1, %v3080_v0  ;;  %2886 = vmatpush3.bf16.msra.mxu0 %v2885_v19  ;;  %v1766_v0 = vld [vmem:[%s3692_s5 + $0x18] sm:$0xff] }
 0x755   :  { %2887 = vmatprep.subr.bf16.mxu0 %v3081_v57  ;;  %v2888_v40 = vpack.c.bf16 %v1766_v0, %v1765_v39 }
 0x758   :  { %2889 = vmatpush3.bf16.msra.mxu0 %v2888_v40 }
 0x759   :  { %2890 = vmatprep.subr.bf16.mxu0 %v3081_v57 }
 0x75c   :  { %2892 = vmatpush3.bf16.msra.mxu0 %v2891_v46 }
 0x75d   :  { %2893 = vmatprep.subr.bf16.mxu0 %v3081_v57 }
 0x760   :  { %2895 = vmatpush3.bf16.msra.mxu0 %v2894_v50 }
 0x761   :  { %2896 = vmatprep.subr.bf16.mxu0 %v3081_v57 }
 0x764   :  { %2898 = vmatpush3.bf16.msra.mxu0 %v2897_v61 }
 0x765   :  { %2899 = vmatprep.subr.bf16.mxu0 %v3081_v57 }
 0x768   :  { %2901 = vmatpush3.bf16.msra.mxu0 %v2900_v1 }
 0x769   :  { %2902 = vmatprep.subr.bf16.mxu0 %v3081_v57 }
 0x76c   :  { %2904 = vmatpush3.bf16.msra.mxu0 %v2903_v4 }
 0x76d   :  { %2905 = vmatprep.subr.bf16.mxu0 %v3081_v57 }
 0x770   :  { %2907 = vmatpush3.bf16.msra.mxu0 %v2906_v14 }
 0x826   :  { %v1661_v15 = vpop.f32.mrb[14].mxu0  ;;  %v1732_v56 = vpop.f32.mrb[22].mxu1 }
 0x827   :  { %v2922_v17 = vadd.f32 %v1661_v15, %v3353_v5  ;;  %v1663_v16 = vpop.f32.mrb[15].mxu0  ;;  %v2384_v23 = vpop.f32.mrb[23].mxu1  ;;  %v1750_v57 = vadd.f32 %v3368_v37, %v1732_v56 }
 0x828   :  { %v2923_v26 = vadd.f32 %v1663_v16, %v3357_v11 }
 0x829   :  { %v1917_v24 = vmul.f32 -1.442695, %v2922_v17 }
 0x82a   :  { %v1918_v27 = vmul.f32 -1.442695, %v2923_v26 }
 0x82b   :  { %3017 = vpow2.f32 %v1917_v24 }
 0x82c   :  { %3019 = vpow2.f32 %v1918_v27 }
 0x835   :  { %v3018_v29 = vpop.eup %3017 }
 0x836   :  { %v1744_v32 = vadd.f32 1.0, %v3018_v29  ;;  %v3020_v34 = vpop.eup %3019 }
 0x837   :  { %v1745_v59 = vadd.f32 1.0, %v3020_v34 }
 0x838   :  { %3021 = vrcp.f32 %v1744_v32 }
 0x839   :  { %3023 = vrcp.f32 %v1745_v59 }
 0x842   :  { %v3022_v36 = vpop.eup %3021 }
 0x843   :  { %v1751_v21 = vmul.f32 %v3022_v36, %v1750_v57  ;;  %v3024_v22 = vpop.eup %3023 }
 0x844   :  { %v1754_v30 = vsub.f32 1.0, %v3024_v22  ;;  %v1756_v41 = vmul.f32 %v3024_v22, %v3604_v38 }
 0x845   :  { %v1752_v5 = vadd.f32 %v1751_v21, %v3359_v13 }
 0x847   :  { %3025 = vtanh.f32 %v1752_v5 }
 0x851   :  { %v3026_v33 = vpop.eup %3025 }
 0x852   :  { %v1755_v11 = vmul.f32 %v3026_v33, %v1754_v30 }
 0x854   :  { %v1757_v44 = vadd.f32 %v1756_v41, %v1755_v11 }
 0x856   :  { %2418 = vmatmul.mubr.f32.vlgmr.msra.gmra.mrb[16].mxu0 %v1757_v44 }
 0x929   :  { %v1852_v51 = vpop.f32.mrb[16].mxu0 }
 0x92a   :  { %v1853_v37 = vadd.f32 %v1919_v49, %v1852_v51  ;;  %v2419_v54 = vpop.f32.mrb[17].mxu0 }
 0x92c   :  { %v1856_v60 = vmul.f32 %v1853_v37, %v1853_v37 }
 0x92e   :  { %v1857_v62 = vsel %vm83_vm0, %v1856_v60, 0.0 }
 0x92f   :  { %1858 = vadd.xlane.f32.xlu0 %v1857_v62 }
 0x9bc   :  { %v1859_v13 = vpop.xlane.xlu0 %1858 }
 0x9bd   :  { %v1860_v2 = vmax.f32 %v1859_v13, 1e-24 }
 0x9bf   :  { %3027 = vrsqrt.f32 %v1860_v2 }
 0x9c9   :  { %v3028_v7 = vpop.eup %3027 }
 0x9ca   :  { %v1862_v9 = vmul.f32 %v3028_v7, %v1853_v37 }
 0x9cc   :  { %1863 = vst.msk [vmem:[#allocation7] sm:$0xff] %vm83_vm0, %v1862_v9 }
 0x9cd   :  { %3062 = shalt.err (!%p3059_p12)
}
 0x9ce   :  { %s3063_s16 = scalar_lea.hbm %s3694_s7, 128 }
 0x9cf   :  { %p3064_p13 = scmp.ne.s32.totalorder %s3694_s7, %s3063_s16  ;;  %p3067_p0 = scmp.lt.u32.totalorder %s3063_s16, %s3694_s7 }
 0x9d1   :  { %p3069_p1 = pnand %p3067_p0, %p3064_p13 }
 0x9d3   :  { %3072 = shalt.err (!%p3069_p1)
}
 0x9d4   :  { %1873 = dma.vmem_to_hbm [thread:$0]  %s1871_s13, 128, %s3694_s7, [#allocation6]  }
 0x9d5   :  { %3075 = dma.done.wait [#allocation6], 128  }
 0x9d6   :  { %3076 = vsyncadd [#allocation6], 4294967168 }
 0x9d7   :  { %1877 = vsyncpa [#allocation5], 1 }
 0x9d8   :  { %1878 = vsyncpa [#allocation6], 1 }

</bundles_post_ra>
